<compile_context>
chip_gen: v6e
topology: v6e:2x2x1
jax: 0.10.0
libtpu: 0.0.40
codegen_flags: <defaults>
</compile_context>

<pallas_src>
import numpy as np

import jax
import jax.numpy as jnp
from jax import lax
from jax.experimental import pallas as pl
from jax.experimental.pallas import tpu as pltpu

# ----------------------------- configuration -------------------------------
INPUT_SHAPE = (2, 4, 16, 16)       # NCHW
OUTPUT_DIM = 5
KERNEL_SIZES = (3, 3)
STRIDES = (1, 1)
HIDDEN_CHANNELS = (8, 16)
HIDDEN_SIZES = (32, 32)
IS_IMAGE = True

assert STRIDES == (1, 1), "block-Toeplitz conv path below assumes stride 1"

_B, C0, H0, W0 = INPUT_SHAPE
KH1, KH2 = KERNEL_SIZES
C1, C2 = HIDDEN_CHANNELS
OH1, OW1 = H0 - KH1 + 1, W0 - KH1 + 1          # 14, 14
OH2, OW2 = OH1 - KH2 + 1, OW1 - KH2 + 1        # 12, 12
FLAT = C2 * OH2 * OW2                           # 2304
HID = HIDDEN_SIZES
HEAD_H1 = 2 * HID[0]                            # 64  (value | advantage)
HEAD_H2 = 2 * HID[1]                            # 64
HEAD_OUT = 1 + OUTPUT_DIM                       # 6   (value | advantage)


# ------------------------------ fused kernel --------------------------------
def _fused_kernel(x_ref, t1_ref, b1_ref, t2_ref, b2_ref,
                  w1_ref, c1_ref, w2_ref, c2_ref, w3_ref, c3_ref,
                  o_ref, f_ref):
    """Whole forward pass for one image; everything stays in VMEM."""
    x = x_ref[0]                                            # (H0, W0*C0)

    # conv1: sum over kernel rows of shifted matmuls vs block-Toeplitz weights
    acc1 = jnp.zeros((OH1, OW1 * C1), jnp.float32)
    for i in range(KH1):
        acc1 = acc1 + jnp.dot(x[i:i + OH1, :], t1_ref[i],
                              preferred_element_type=jnp.float32)
    y1 = jnp.maximum(acc1 + b1_ref[...], 0.0)               # (OH1, OW1*C1)

    # conv2
    acc2 = jnp.zeros((OH2, OW2 * C2), jnp.float32)
    for i in range(KH2):
        acc2 = acc2 + jnp.dot(y1[i:i + OH2, :], t2_ref[i],
                              preferred_element_type=jnp.float32)
    y2 = jnp.maximum(acc2 + b2_ref[...], 0.0)               # (OH2, OW2*C2)
    # (the module's extra post-CNN ReLU is idempotent after conv ReLU: omitted)

    # flatten NHWC rows into a single (1, FLAT) lane vector via VMEM scratch
    row = OW2 * C2
    for h in range(OH2):
        f_ref[0:1, h * row:(h + 1) * row] = y2[h:h + 1, :]
    f = f_ref[...]                                          # (1, FLAT)

    # fused dueling heads: cols 0..31 = value MLP, cols 32..63 = advantage MLP
    h1 = jnp.maximum(
        jnp.dot(f, w1_ref[...], preferred_element_type=jnp.float32) + c1_ref[...],
        0.0)
    h2 = jnp.maximum(
        jnp.dot(h1, w2_ref[...], preferred_element_type=jnp.float32) + c2_ref[...],
        0.0)
    o = jnp.dot(h2, w3_ref[...],
                preferred_element_type=jnp.float32) + c3_ref[...]   # (1, 1+A)

    val = o[:, 0:1]
    adv = o[:, 1:1 + OUTPUT_DIM]
    o_ref[0] = val + adv - jnp.mean(adv, axis=1, keepdims=True)


@jax.jit
def forward(x_nchw, kp):
    """Forward pass of DiscreteDuelingCNNModule via one fused pallas_call."""
    b = x_nchw.shape[0]
    # NCHW -> (B, H, W*C): the only (tiny, 8 KiB) XLA op outside the kernel.
    x = jnp.transpose(x_nchw.astype(jnp.float32), (0, 2, 3, 1)).reshape(
        b, H0, W0 * C0)

    out = pl.pallas_call(
        _fused_kernel,
        out_shape=jax.ShapeDtypeStruct((b, 1, OUTPUT_DIM), jnp.float32),
        grid=(b,),
        in_specs=[
            pl.BlockSpec((1, H0, W0 * C0), lambda i: (i, 0, 0)),            # x
            pl.BlockSpec((KH1, W0 * C0, OW1 * C1), lambda i: (0, 0, 0)),    # T1
            pl.BlockSpec((1, OW1 * C1), lambda i: (0, 0)),                  # b1
            pl.BlockSpec((KH2, OW1 * C1, OW2 * C2), lambda i: (0, 0, 0)),   # T2
            pl.BlockSpec((1, OW2 * C2), lambda i: (0, 0)),                  # b2
            pl.BlockSpec((FLAT, HEAD_H1), lambda i: (0, 0)),                # W1
            pl.BlockSpec((1, HEAD_H1), lambda i: (0, 0)),                   # b1h
            pl.BlockSpec((HEAD_H1, HEAD_H2), lambda i: (0, 0)),             # W2
            pl.BlockSpec((1, HEAD_H2), lambda i: (0, 0)),                   # b2h
            pl.BlockSpec((HEAD_H2, HEAD_OUT), lambda i: (0, 0)),            # W3
            pl.BlockSpec((1, HEAD_OUT), lambda i: (0, 0)),                  # b3h
        ],
        out_specs=pl.BlockSpec((1, 1, OUTPUT_DIM), lambda i: (i, 0, 0)),
        scratch_shapes=[pltpu.VMEM((1, FLAT), jnp.float32)],
        compiler_params=pltpu.CompilerParams(
            dimension_semantics=("parallel",)),
    )(x, kp['t1'], kp['b1t'], kp['t2'], kp['b2t'],
      kp['w1h'], kp['b1h'], kp['w2h'], kp['b2h'], kp['w3h'], kp['b3h'])
    return out.reshape(b, OUTPUT_DIM)


# --------------------- parameter construction & packing ----------------------
def _xavier_uniform(key, shape, fan_in, fan_out):
    a = (6.0 / (fan_in + fan_out)) ** 0.5
    return jax.random.uniform(key, shape, jnp.float32, -a, a)


def init_params(key):
    """'Native' parameters laid out like the PyTorch module.

    Conv weights are HWIO; head weights are (in, out) with rows ordered like
    torch.flatten of the NCHW conv output. Biases get small random values so
    the bias plumbing is actually exercised by the correctness check.
    """
    keys = iter(jax.random.split(key, 20))
    p = {}
    p['conv1_w'] = _xavier_uniform(next(keys), (KH1, KH1, C0, C1),
                                   fan_in=C0 * KH1 * KH1, fan_out=C1 * KH1 * KH1)
    p['conv1_b'] = jax.random.uniform(next(keys), (C1,), jnp.float32, -0.1, 0.1)
    p['conv2_w'] = _xavier_uniform(next(keys), (KH2, KH2, C1, C2),
                                   fan_in=C1 * KH2 * KH2, fan_out=C2 * KH2 * KH2)
    p['conv2_b'] = jax.random.uniform(next(keys), (C2,), jnp.float32, -0.1, 0.1)

    def make_mlp(out_dim):
        dims = (FLAT,) + HIDDEN_SIZES + (out_dim,)
        layers = []
        for din, dout in zip(dims[:-1], dims[1:]):
            layers.append(_xavier_uniform(next(keys), (din, dout), din, dout))
            layers.append(jax.random.uniform(next(keys), (dout,), jnp.float32,
                                             -0.1, 0.1))
        return tuple(layers)

    p['val'] = make_mlp(1)
    p['act'] = make_mlp(OUTPUT_DIM)
    return p


def _block_toeplitz(w_hwio, w_in, scale=1.0):
    """Per-kernel-row block-Toeplitz matrices for a stride-1 VALID conv.

    T[i, w*Cin + ci, ow*Cout + co] = scale * w_hwio[i, w-ow, ci, co] (0<=w-ow<KW)
    so that  y[oh, ow*Cout+co] = sum_i  x_rows[oh+i, :] @ T[i].
    """
    kh, kw, cin, cout = w_hwio.shape
    ow_out = w_in - kw + 1
    wk = np.asarray(w_hwio, np.float32) * scale
    t = np.zeros((kh, w_in * cin, ow_out * cout), np.float32)
    for i in range(kh):
        for ow in range(ow_out):
            for j in range(kw):
                w = ow + j
                t[i, w * cin:(w + 1) * cin, ow * cout:(ow + 1) * cout] = wk[i, j]
    return jnp.asarray(t)


def pack_params(p):
    """Offline re-layout of native params into the fused kernel's operands."""
    kp = {}
    scale = (1.0 / 255.0) if IS_IMAGE else 1.0   # fold image norm into conv1 W
    kp['t1'] = _block_toeplitz(p['conv1_w'], W0, scale=scale)
    kp['b1t'] = jnp.tile(p['conv1_b'], OW1).reshape(1, OW1 * C1)
    kp['t2'] = _block_toeplitz(p['conv2_w'], OW1)
    kp['b2t'] = jnp.tile(p['conv2_b'], OW2).reshape(1, OW2 * C2)

    vw1, vb1, vw2, vb2, vw3, vb3 = p['val']
    aw1, ab1, aw2, ab2, aw3, ab3 = p['act']

    # rows: NHWC-flatten index (kernel layout) -> NCHW-flatten index (torch)
    hh, ww, cc = np.meshgrid(np.arange(OH2), np.arange(OW2), np.arange(C2),
                             indexing='ij')
    perm = (cc * (OH2 * OW2) + hh * OW2 + ww).reshape(-1).astype(np.int32)

    kp['w1h'] = jnp.concatenate([vw1, aw1], axis=1)[perm]            # (FLAT, 64)
    kp['b1h'] = jnp.concatenate([vb1, ab1]).reshape(1, HEAD_H1)

    z = jnp.zeros((HID[0], HID[1]), jnp.float32)
    kp['w2h'] = jnp.concatenate(
        [jnp.concatenate([vw2, z], axis=1),
         jnp.concatenate([z, aw2], axis=1)], axis=0)                 # (64, 64)
    kp['b2h'] = jnp.concatenate([vb2, ab2]).reshape(1, HEAD_H2)

    kp['w3h'] = jnp.concatenate(
        [jnp.concatenate([vw3, jnp.zeros((HID[1], OUTPUT_DIM), jnp.float32)],
                         axis=1),
         jnp.concatenate([jnp.zeros((HID[1], 1), jnp.float32), aw3], axis=1)],
        axis=0)                                                      # (64, 6)
    kp['b3h'] = jnp.concatenate([vb3, ab3]).reshape(1, HEAD_OUT)
    return kp


# ------------------------------ pure-JAX reference ---------------------------
def reference(x_nchw, p):
    x = x_nchw.astype(jnp.float32)
    if IS_IMAGE:
        x = x / 255.0
    for w_hwio, b in ((p['conv1_w'], p['conv1_b']), (p['conv2_w'], p['conv2_b'])):
        x = lax.conv_general_dilated(x, w_hwio, STRIDES, 'VALID',
                                     dimension_numbers=('NCHW', 'HWIO', 'NCHW'))
        x = jnp.maximum(x + b.reshape(1, -1, 1, 1), 0.0)
    f = jnp.maximum(x.reshape(x.shape[0], -1), 0.0)   # Sequential(.., ReLU, Flatten)

    def mlp(h, params):
        w1, b1, w2, b2, w3, b3 = params
        h = jnp.maximum(h @ w1 + b1, 0.0)
        h = jnp.maximum(h @ w2 + b2, 0.0)
        return h @ w3 + b3

    val = mlp(f, p['val'])
    adv = mlp(f, p['act'])
    return val + adv - adv.mean(axis=1, keepdims=True)


# ----------------------------------- main ------------------------------------
if __name__ == "__main__":
    key = jax.random.PRNGKey(0)
    k_in, k_p = jax.random.split(key)
    x = jax.random.uniform(k_in, INPUT_SHAPE, jnp.float32, 0.0, 255.0)  # image-like
    params = init_params(k_p)
    kparams = pack_params(params)

    out = jax.block_until_ready(forward(x, kparams))
    ref = reference(x, params)

    assert out.shape == (INPUT_SHAPE[0], OUTPUT_DIM)
    assert jnp.allclose(out, ref, rtol=1e-4, atol=1e-4), (out, ref)
    print("KERNEL_OK")
</pallas_src>

<mosaic_0001>
module attributes {stable_mosaic.version = 11 : i64} {
  func.func @_fused_kernel(%arg0: i32, %arg1: memref<1x16x64xf32, #tpu.memory_space<vmem>>, %arg2: memref<3x64x112xf32, #tpu.memory_space<vmem>>, %arg3: memref<1x112xf32, #tpu.memory_space<vmem>>, %arg4: memref<3x112x192xf32, #tpu.memory_space<vmem>>, %arg5: memref<1x192xf32, #tpu.memory_space<vmem>>, %arg6: memref<2304x64xf32, #tpu.memory_space<vmem>>, %arg7: memref<1x64xf32, #tpu.memory_space<vmem>>, %arg8: memref<64x64xf32, #tpu.memory_space<vmem>>, %arg9: memref<1x64xf32, #tpu.memory_space<vmem>>, %arg10: memref<64x6xf32, #tpu.memory_space<vmem>>, %arg11: memref<1x6xf32, #tpu.memory_space<vmem>>, %arg12: memref<1x1x5xf32, #tpu.memory_space<vmem>>, %arg13: memref<1x2304xf32, #tpu.memory_space<vmem>>) attributes {dimension_semantics = [#tpu.dimension_semantics<parallel>], iteration_bounds = array<i64: 2>, scalar_prefetch = 0 : i64, scratch_operands = 1 : i64, tpu.core_type = #tpu.core_type<tc>, window_params = [{transform_indices = @transform_0, window_bounds = array<i64: 1, 16, 64>}, {pipeline_mode = #tpu.pipeline_mode<synchronous>, transform_indices = @transform_1, window_bounds = array<i64: 3, 64, 112>}, {pipeline_mode = #tpu.pipeline_mode<synchronous>, transform_indices = @transform_2, window_bounds = array<i64: 1, 112>}, {pipeline_mode = #tpu.pipeline_mode<synchronous>, transform_indices = @transform_3, window_bounds = array<i64: 3, 112, 192>}, {pipeline_mode = #tpu.pipeline_mode<synchronous>, transform_indices = @transform_4, window_bounds = array<i64: 1, 192>}, {pipeline_mode = #tpu.pipeline_mode<synchronous>, transform_indices = @transform_5, window_bounds = array<i64: 2304, 64>}, {pipeline_mode = #tpu.pipeline_mode<synchronous>, transform_indices = @transform_6, window_bounds = array<i64: 1, 64>}, {pipeline_mode = #tpu.pipeline_mode<synchronous>, transform_indices = @transform_7, window_bounds = array<i64: 64, 64>}, {pipeline_mode = #tpu.pipeline_mode<synchronous>, transform_indices = @transform_8, window_bounds = array<i64: 1, 64>}, {pipeline_mode = #tpu.pipeline_mode<synchronous>, transform_indices = @transform_9, window_bounds = array<i64: 64, 6>}, {pipeline_mode = #tpu.pipeline_mode<synchronous>, transform_indices = @transform_10, window_bounds = array<i64: 1, 6>}, {transform_indices = @transform_11, window_bounds = array<i64: 1, 1, 5>}]} {
    %c0 = arith.constant 0 : index
    %c0_0 = arith.constant 0 : index
    %c0_1 = arith.constant 0 : index
    %0 = vector.load %arg1[%c0, %c0_0, %c0_1] : memref<1x16x64xf32, #tpu.memory_space<vmem>>, vector<1x16x64xf32>
    %1 = vector.shape_cast %0 : vector<1x16x64xf32> to vector<16x64xf32>
    %cst = arith.constant 0.000000e+00 : f32
    %2 = vector.broadcast %cst : f32 to vector<14x112xf32>
    %3 = vector.extract_strided_slice %1 {offsets = [0, 0], sizes = [14, 64], strides = [1, 1]} : vector<16x64xf32> to vector<14x64xf32>
    %c0_2 = arith.constant 0 : index
    %c0_3 = arith.constant 0 : index
    %c0_4 = arith.constant 0 : index
    %4 = vector.load %arg2[%c0_2, %c0_3, %c0_4] : memref<3x64x112xf32, #tpu.memory_space<vmem>>, vector<1x64x112xf32>
    %5 = vector.shape_cast %4 : vector<1x64x112xf32> to vector<64x112xf32>
    %cst_5 = arith.constant dense<0.000000e+00> : vector<14x112xf32>
    %6 = tpu.matmul %3, %5, %cst_5 {dimension_numbers = #tpu.dot_dimension_numbers<[1], [0], [0], [1], [0, 0, 1, 1], [], []>} : vector<14x64xf32>, vector<64x112xf32>, vector<14x112xf32> -> vector<14x112xf32>
    %7 = arith.addf %2, %6 : vector<14x112xf32>
    %8 = vector.extract_strided_slice %1 {offsets = [1, 0], sizes = [14, 64], strides = [1, 1]} : vector<16x64xf32> to vector<14x64xf32>
    %c1 = arith.constant 1 : index
    %c0_6 = arith.constant 0 : index
    %c0_7 = arith.constant 0 : index
    %9 = vector.load %arg2[%c1, %c0_6, %c0_7] : memref<3x64x112xf32, #tpu.memory_space<vmem>>, vector<1x64x112xf32>
    %10 = vector.shape_cast %9 : vector<1x64x112xf32> to vector<64x112xf32>
    %cst_8 = arith.constant dense<0.000000e+00> : vector<14x112xf32>
    %11 = tpu.matmul %8, %10, %cst_8 {dimension_numbers = #tpu.dot_dimension_numbers<[1], [0], [0], [1], [0, 0, 1, 1], [], []>} : vector<14x64xf32>, vector<64x112xf32>, vector<14x112xf32> -> vector<14x112xf32>
    %12 = arith.addf %7, %11 : vector<14x112xf32>
    %13 = vector.extract_strided_slice %1 {offsets = [2, 0], sizes = [14, 64], strides = [1, 1]} : vector<16x64xf32> to vector<14x64xf32>
    %c2 = arith.constant 2 : index
    %c0_9 = arith.constant 0 : index
    %c0_10 = arith.constant 0 : index
    %14 = vector.load %arg2[%c2, %c0_9, %c0_10] : memref<3x64x112xf32, #tpu.memory_space<vmem>>, vector<1x64x112xf32>
    %15 = vector.shape_cast %14 : vector<1x64x112xf32> to vector<64x112xf32>
    %cst_11 = arith.constant dense<0.000000e+00> : vector<14x112xf32>
    %16 = tpu.matmul %13, %15, %cst_11 {dimension_numbers = #tpu.dot_dimension_numbers<[1], [0], [0], [1], [0, 0, 1, 1], [], []>} : vector<14x64xf32>, vector<64x112xf32>, vector<14x112xf32> -> vector<14x112xf32>
    %17 = arith.addf %12, %16 : vector<14x112xf32>
    %c0_12 = arith.constant 0 : index
    %c0_13 = arith.constant 0 : index
    %18 = vector.load %arg3[%c0_12, %c0_13] : memref<1x112xf32, #tpu.memory_space<vmem>>, vector<1x112xf32>
    %19 = vector.broadcast %18 : vector<1x112xf32> to vector<14x112xf32>
    %20 = arith.addf %17, %19 : vector<14x112xf32>
    %cst_14 = arith.constant 0.000000e+00 : f32
    %21 = vector.broadcast %cst_14 : f32 to vector<14x112xf32>
    %22 = arith.maximumf %20, %21 : vector<14x112xf32>
    %cst_15 = arith.constant 0.000000e+00 : f32
    %23 = vector.broadcast %cst_15 : f32 to vector<12x192xf32>
    %24 = vector.extract_strided_slice %22 {offsets = [0, 0], sizes = [12, 112], strides = [1, 1]} : vector<14x112xf32> to vector<12x112xf32>
    %c0_16 = arith.constant 0 : index
    %c0_17 = arith.constant 0 : index
    %c0_18 = arith.constant 0 : index
    %25 = vector.load %arg4[%c0_16, %c0_17, %c0_18] : memref<3x112x192xf32, #tpu.memory_space<vmem>>, vector<1x112x192xf32>
    %26 = vector.shape_cast %25 : vector<1x112x192xf32> to vector<112x192xf32>
    %cst_19 = arith.constant dense<0.000000e+00> : vector<12x192xf32>
    %27 = tpu.matmul %24, %26, %cst_19 {dimension_numbers = #tpu.dot_dimension_numbers<[1], [0], [0], [1], [0, 0, 1, 1], [], []>} : vector<12x112xf32>, vector<112x192xf32>, vector<12x192xf32> -> vector<12x192xf32>
    %28 = arith.addf %23, %27 : vector<12x192xf32>
    %29 = vector.extract_strided_slice %22 {offsets = [1, 0], sizes = [12, 112], strides = [1, 1]} : vector<14x112xf32> to vector<12x112xf32>
    %c1_20 = arith.constant 1 : index
    %c0_21 = arith.constant 0 : index
    %c0_22 = arith.constant 0 : index
    %30 = vector.load %arg4[%c1_20, %c0_21, %c0_22] : memref<3x112x192xf32, #tpu.memory_space<vmem>>, vector<1x112x192xf32>
    %31 = vector.shape_cast %30 : vector<1x112x192xf32> to vector<112x192xf32>
    %cst_23 = arith.constant dense<0.000000e+00> : vector<12x192xf32>
    %32 = tpu.matmul %29, %31, %cst_23 {dimension_numbers = #tpu.dot_dimension_numbers<[1], [0], [0], [1], [0, 0, 1, 1], [], []>} : vector<12x112xf32>, vector<112x192xf32>, vector<12x192xf32> -> vector<12x192xf32>
    %33 = arith.addf %28, %32 : vector<12x192xf32>
    %34 = vector.extract_strided_slice %22 {offsets = [2, 0], sizes = [12, 112], strides = [1, 1]} : vector<14x112xf32> to vector<12x112xf32>
    %c2_24 = arith.constant 2 : index
    %c0_25 = arith.constant 0 : index
    %c0_26 = arith.constant 0 : index
    %35 = vector.load %arg4[%c2_24, %c0_25, %c0_26] : memref<3x112x192xf32, #tpu.memory_space<vmem>>, vector<1x112x192xf32>
    %36 = vector.shape_cast %35 : vector<1x112x192xf32> to vector<112x192xf32>
    %cst_27 = arith.constant dense<0.000000e+00> : vector<12x192xf32>
    %37 = tpu.matmul %34, %36, %cst_27 {dimension_numbers = #tpu.dot_dimension_numbers<[1], [0], [0], [1], [0, 0, 1, 1], [], []>} : vector<12x112xf32>, vector<112x192xf32>, vector<12x192xf32> -> vector<12x192xf32>
    %38 = arith.addf %33, %37 : vector<12x192xf32>
    %c0_28 = arith.constant 0 : index
    %c0_29 = arith.constant 0 : index
    %39 = vector.load %arg5[%c0_28, %c0_29] : memref<1x192xf32, #tpu.memory_space<vmem>>, vector<1x192xf32>
    %40 = vector.broadcast %39 : vector<1x192xf32> to vector<12x192xf32>
    %41 = arith.addf %38, %40 : vector<12x192xf32>
    %cst_30 = arith.constant 0.000000e+00 : f32
    %42 = vector.broadcast %cst_30 : f32 to vector<12x192xf32>
    %43 = arith.maximumf %41, %42 : vector<12x192xf32>
    %44 = vector.extract_strided_slice %43 {offsets = [0, 0], sizes = [1, 192], strides = [1, 1]} : vector<12x192xf32> to vector<1x192xf32>
    %c0_31 = arith.constant 0 : index
    %c0_32 = arith.constant 0 : index
    %45 = vector.load %arg13[%c0_31, %c0_32] : memref<1x2304xf32, #tpu.memory_space<vmem>>, vector<1x192xf32>
    tpu.vector_store %arg13[%c0_31, %c0_32], %44 {strides = array<i32>} : memref<1x2304xf32, #tpu.memory_space<vmem>>, vector<1x192xf32>,
    %46 = vector.extract_strided_slice %43 {offsets = [1, 0], sizes = [1, 192], strides = [1, 1]} : vector<12x192xf32> to vector<1x192xf32>
    %c0_33 = arith.constant 0 : index
    %c192 = arith.constant 192 : index
    %47 = vector.load %arg13[%c0_33, %c192] : memref<1x2304xf32, #tpu.memory_space<vmem>>, vector<1x192xf32>
    tpu.vector_store %arg13[%c0_33, %c192], %46 {strides = array<i32>} : memref<1x2304xf32, #tpu.memory_space<vmem>>, vector<1x192xf32>,
    %48 = vector.extract_strided_slice %43 {offsets = [2, 0], sizes = [1, 192], strides = [1, 1]} : vector<12x192xf32> to vector<1x192xf32>
    %c0_34 = arith.constant 0 : index
    %c384 = arith.constant 384 : index
    %49 = vector.load %arg13[%c0_34, %c384] : memref<1x2304xf32, #tpu.memory_space<vmem>>, vector<1x192xf32>
    tpu.vector_store %arg13[%c0_34, %c384], %48 {strides = array<i32>} : memref<1x2304xf32, #tpu.memory_space<vmem>>, vector<1x192xf32>,
    %50 = vector.extract_strided_slice %43 {offsets = [3, 0], sizes = [1, 192], strides = [1, 1]} : vector<12x192xf32> to vector<1x192xf32>
    %c0_35 = arith.constant 0 : index
    %c576 = arith.constant 576 : index
    %51 = vector.load %arg13[%c0_35, %c576] : memref<1x2304xf32, #tpu.memory_space<vmem>>, vector<1x192xf32>
    tpu.vector_store %arg13[%c0_35, %c576], %50 {strides = array<i32>} : memref<1x2304xf32, #tpu.memory_space<vmem>>, vector<1x192xf32>,
    %52 = vector.extract_strided_slice %43 {offsets = [4, 0], sizes = [1, 192], strides = [1, 1]} : vector<12x192xf32> to vector<1x192xf32>
    %c0_36 = arith.constant 0 : index
    %c768 = arith.constant 768 : index
    %53 = vector.load %arg13[%c0_36, %c768] : memref<1x2304xf32, #tpu.memory_space<vmem>>, vector<1x192xf32>
    tpu.vector_store %arg13[%c0_36, %c768], %52 {strides = array<i32>} : memref<1x2304xf32, #tpu.memory_space<vmem>>, vector<1x192xf32>,
    %54 = vector.extract_strided_slice %43 {offsets = [5, 0], sizes = [1, 192], strides = [1, 1]} : vector<12x192xf32> to vector<1x192xf32>
    %c0_37 = arith.constant 0 : index
    %c960 = arith.constant 960 : index
    %55 = vector.load %arg13[%c0_37, %c960] : memref<1x2304xf32, #tpu.memory_space<vmem>>, vector<1x192xf32>
    tpu.vector_store %arg13[%c0_37, %c960], %54 {strides = array<i32>} : memref<1x2304xf32, #tpu.memory_space<vmem>>, vector<1x192xf32>,
    %56 = vector.extract_strided_slice %43 {offsets = [6, 0], sizes = [1, 192], strides = [1, 1]} : vector<12x192xf32> to vector<1x192xf32>
    %c0_38 = arith.constant 0 : index
    %c1152 = arith.constant 1152 : index
    %57 = vector.load %arg13[%c0_38, %c1152] : memref<1x2304xf32, #tpu.memory_space<vmem>>, vector<1x192xf32>
    tpu.vector_store %arg13[%c0_38, %c1152], %56 {strides = array<i32>} : memref<1x2304xf32, #tpu.memory_space<vmem>>, vector<1x192xf32>,
    %58 = vector.extract_strided_slice %43 {offsets = [7, 0], sizes = [1, 192], strides = [1, 1]} : vector<12x192xf32> to vector<1x192xf32>
    %c0_39 = arith.constant 0 : index
    %c1344 = arith.constant 1344 : index
    %59 = vector.load %arg13[%c0_39, %c1344] : memref<1x2304xf32, #tpu.memory_space<vmem>>, vector<1x192xf32>
    tpu.vector_store %arg13[%c0_39, %c1344], %58 {strides = array<i32>} : memref<1x2304xf32, #tpu.memory_space<vmem>>, vector<1x192xf32>,
    %60 = vector.extract_strided_slice %43 {offsets = [8, 0], sizes = [1, 192], strides = [1, 1]} : vector<12x192xf32> to vector<1x192xf32>
    %c0_40 = arith.constant 0 : index
    %c1536 = arith.constant 1536 : index
    %61 = vector.load %arg13[%c0_40, %c1536] : memref<1x2304xf32, #tpu.memory_space<vmem>>, vector<1x192xf32>
    tpu.vector_store %arg13[%c0_40, %c1536], %60 {strides = array<i32>} : memref<1x2304xf32, #tpu.memory_space<vmem>>, vector<1x192xf32>,
    %62 = vector.extract_strided_slice %43 {offsets = [9, 0], sizes = [1, 192], strides = [1, 1]} : vector<12x192xf32> to vector<1x192xf32>
    %c0_41 = arith.constant 0 : index
    %c1728 = arith.constant 1728 : index
    %63 = vector.load %arg13[%c0_41, %c1728] : memref<1x2304xf32, #tpu.memory_space<vmem>>, vector<1x192xf32>
    tpu.vector_store %arg13[%c0_41, %c1728], %62 {strides = array<i32>} : memref<1x2304xf32, #tpu.memory_space<vmem>>, vector<1x192xf32>,
    %64 = vector.extract_strided_slice %43 {offsets = [10, 0], sizes = [1, 192], strides = [1, 1]} : vector<12x192xf32> to vector<1x192xf32>
    %c0_42 = arith.constant 0 : index
    %c1920 = arith.constant 1920 : index
    %65 = vector.load %arg13[%c0_42, %c1920] : memref<1x2304xf32, #tpu.memory_space<vmem>>, vector<1x192xf32>
    tpu.vector_store %arg13[%c0_42, %c1920], %64 {strides = array<i32>} : memref<1x2304xf32, #tpu.memory_space<vmem>>, vector<1x192xf32>,
    %66 = vector.extract_strided_slice %43 {offsets = [11, 0], sizes = [1, 192], strides = [1, 1]} : vector<12x192xf32> to vector<1x192xf32>
    %c0_43 = arith.constant 0 : index
    %c2112 = arith.constant 2112 : index
    %67 = vector.load %arg13[%c0_43, %c2112] : memref<1x2304xf32, #tpu.memory_space<vmem>>, vector<1x192xf32>
    tpu.vector_store %arg13[%c0_43, %c2112], %66 {strides = array<i32>} : memref<1x2304xf32, #tpu.memory_space<vmem>>, vector<1x192xf32>,
    %c0_44 = arith.constant 0 : index
    %c0_45 = arith.constant 0 : index
    %68 = vector.load %arg13[%c0_44, %c0_45] : memref<1x2304xf32, #tpu.memory_space<vmem>>, vector<1x2304xf32>
    %c0_46 = arith.constant 0 : index
    %c0_47 = arith.constant 0 : index
    %69 = vector.load %arg6[%c0_46, %c0_47] : memref<2304x64xf32, #tpu.memory_space<vmem>>, vector<2304x64xf32>
    %cst_48 = arith.constant dense<0.000000e+00> : vector<1x64xf32>
    %70 = tpu.matmul %68, %69, %cst_48 {dimension_numbers = #tpu.dot_dimension_numbers<[1], [0], [0], [1], [0, 0, 1, 1], [], []>} : vector<1x2304xf32>, vector<2304x64xf32>, vector<1x64xf32> -> vector<1x64xf32>
    %c0_49 = arith.constant 0 : index
    %c0_50 = arith.constant 0 : index
    %71 = vector.load %arg7[%c0_49, %c0_50] : memref<1x64xf32, #tpu.memory_space<vmem>>, vector<1x64xf32>
    %72 = arith.addf %70, %71 : vector<1x64xf32>
    %cst_51 = arith.constant 0.000000e+00 : f32
    %73 = vector.broadcast %cst_51 : f32 to vector<1x64xf32>
    %74 = arith.maximumf %72, %73 : vector<1x64xf32>
    %c0_52 = arith.constant 0 : index
    %c0_53 = arith.constant 0 : index
    %75 = vector.load %arg8[%c0_52, %c0_53] : memref<64x64xf32, #tpu.memory_space<vmem>>, vector<64x64xf32>
    %cst_54 = arith.constant dense<0.000000e+00> : vector<1x64xf32>
    %76 = tpu.matmul %74, %75, %cst_54 {dimension_numbers = #tpu.dot_dimension_numbers<[1], [0], [0], [1], [0, 0, 1, 1], [], []>} : vector<1x64xf32>, vector<64x64xf32>, vector<1x64xf32> -> vector<1x64xf32>
    %c0_55 = arith.constant 0 : index
    %c0_56 = arith.constant 0 : index
    %77 = vector.load %arg9[%c0_55, %c0_56] : memref<1x64xf32, #tpu.memory_space<vmem>>, vector<1x64xf32>
    %78 = arith.addf %76, %77 : vector<1x64xf32>
    %cst_57 = arith.constant 0.000000e+00 : f32
    %79 = vector.broadcast %cst_57 : f32 to vector<1x64xf32>
    %80 = arith.maximumf %78, %79 : vector<1x64xf32>
    %c0_58 = arith.constant 0 : index
    %c0_59 = arith.constant 0 : index
    %81 = vector.load %arg10[%c0_58, %c0_59] : memref<64x6xf32, #tpu.memory_space<vmem>>, vector<64x6xf32>
    %cst_60 = arith.constant dense<0.000000e+00> : vector<1x6xf32>
    %82 = tpu.matmul %80, %81, %cst_60 {dimension_numbers = #tpu.dot_dimension_numbers<[1], [0], [0], [1], [0, 0, 1, 1], [], []>} : vector<1x64xf32>, vector<64x6xf32>, vector<1x6xf32> -> vector<1x6xf32>
    %c0_61 = arith.constant 0 : index
    %c0_62 = arith.constant 0 : index
    %83 = vector.load %arg11[%c0_61, %c0_62] : memref<1x6xf32, #tpu.memory_space<vmem>>, vector<1x6xf32>
    %84 = arith.addf %82, %83 : vector<1x6xf32>
    %85 = vector.extract_strided_slice %84 {offsets = [0, 0], sizes = [1, 1], strides = [1, 1]} : vector<1x6xf32> to vector<1x1xf32>
    %86 = vector.extract_strided_slice %84 {offsets = [0, 1], sizes = [1, 5], strides = [1, 1]} : vector<1x6xf32> to vector<1x5xf32>
    %87 = vector.broadcast %85 : vector<1x1xf32> to vector<1x5xf32>
    %88 = arith.addf %87, %86 : vector<1x5xf32>
    %cst_63 = arith.constant dense<0.000000e+00> : vector<1xf32>
    %89 = vector.multi_reduction <add>, %86, %cst_63 [1] : vector<1x5xf32> to vector<1xf32>
    %90 = vector.shape_cast %89 : vector<1xf32> to vector<1x1xf32>
    %cst_64 = arith.constant 5.000000e+00 : f32
    %91 = vector.broadcast %cst_64 : f32 to vector<1x1xf32>
    %92 = arith.divf %90, %91 : vector<1x1xf32>
    %93 = vector.broadcast %92 : vector<1x1xf32> to vector<1x5xf32>
    %94 = arith.subf %88, %93 : vector<1x5xf32>
    %c0_65 = arith.constant 0 : index
    %c0_66 = arith.constant 0 : index
    %c0_67 = arith.constant 0 : index
    %95 = vector.load %arg12[%c0_65, %c0_66, %c0_67] : memref<1x1x5xf32, #tpu.memory_space<vmem>>, vector<1x1x5xf32>
    %96 = vector.shape_cast %95 : vector<1x1x5xf32> to vector<1x5xf32>
    %97 = vector.shape_cast %94 : vector<1x5xf32> to vector<1x1x5xf32>
    tpu.vector_store %arg12[%c0_65, %c0_66, %c0_67], %97 {strides = array<i32>} : memref<1x1x5xf32, #tpu.memory_space<vmem>>, vector<1x1x5xf32>,
    return
  }
  func.func @transform_0(%arg0: i32) -> (i32, i32, i32) {
    %c0_i32 = arith.constant 0 : i32
    %c0_i32_0 = arith.constant 0 : i32
    %c0_i32_1 = arith.constant 0 : i32
    return %arg0, %c0_i32, %c0_i32_0 : i32, i32, i32
  }
  func.func @transform_1(%arg0: i32) -> (i32, i32, i32) {
    %c0_i32 = arith.constant 0 : i32
    %c0_i32_0 = arith.constant 0 : i32
    %c0_i32_1 = arith.constant 0 : i32
    %c0_i32_2 = arith.constant 0 : i32
    return %c0_i32, %c0_i32_0, %c0_i32_1 : i32, i32, i32
  }
  func.func @transform_2(%arg0: i32) -> (i32, i32) {
    %c0_i32 = arith.constant 0 : i32
    %c0_i32_0 = arith.constant 0 : i32
    %c0_i32_1 = arith.constant 0 : i32
    return %c0_i32, %c0_i32_0 : i32, i32
  }
  func.func @transform_3(%arg0: i32) -> (i32, i32, i32) {
    %c0_i32 = arith.constant 0 : i32
    %c0_i32_0 = arith.constant 0 : i32
    %c0_i32_1 = arith.constant 0 : i32
    %c0_i32_2 = arith.constant 0 : i32
    return %c0_i32, %c0_i32_0, %c0_i32_1 : i32, i32, i32
  }
  func.func @transform_4(%arg0: i32) -> (i32, i32) {
    %c0_i32 = arith.constant 0 : i32
    %c0_i32_0 = arith.constant 0 : i32
    %c0_i32_1 = arith.constant 0 : i32
    return %c0_i32, %c0_i32_0 : i32, i32
  }
  func.func @transform_5(%arg0: i32) -> (i32, i32) {
    %c0_i32 = arith.constant 0 : i32
    %c0_i32_0 = arith.constant 0 : i32
    %c0_i32_1 = arith.constant 0 : i32
    return %c0_i32, %c0_i32_0 : i32, i32
  }
  func.func @transform_6(%arg0: i32) -> (i32, i32) {
    %c0_i32 = arith.constant 0 : i32
    %c0_i32_0 = arith.constant 0 : i32
    %c0_i32_1 = arith.constant 0 : i32
    return %c0_i32, %c0_i32_0 : i32, i32
  }
  func.func @transform_7(%arg0: i32) -> (i32, i32) {
    %c0_i32 = arith.constant 0 : i32
    %c0_i32_0 = arith.constant 0 : i32
    %c0_i32_1 = arith.constant 0 : i32
    return %c0_i32, %c0_i32_0 : i32, i32
  }
  func.func @transform_8(%arg0: i32) -> (i32, i32) {
    %c0_i32 = arith.constant 0 : i32
    %c0_i32_0 = arith.constant 0 : i32
    %c0_i32_1 = arith.constant 0 : i32
    return %c0_i32, %c0_i32_0 : i32, i32
  }
  func.func @transform_9(%arg0: i32) -> (i32, i32) {
    %c0_i32 = arith.constant 0 : i32
    %c0_i32_0 = arith.constant 0 : i32
    %c0_i32_1 = arith.constant 0 : i32
    return %c0_i32, %c0_i32_0 : i32, i32
  }
  func.func @transform_10(%arg0: i32) -> (i32, i32) {
    %c0_i32 = arith.constant 0 : i32
    %c0_i32_0 = arith.constant 0 : i32
    %c0_i32_1 = arith.constant 0 : i32
    return %c0_i32, %c0_i32_0 : i32, i32
  }
  func.func @transform_11(%arg0: i32) -> (i32, i32, i32) {
    %c0_i32 = arith.constant 0 : i32
    %c0_i32_0 = arith.constant 0 : i32
    %c0_i32_1 = arith.constant 0 : i32
    return %arg0, %c0_i32, %c0_i32_0 : i32, i32, i32
  }
}

</mosaic_0001>

<bundles_post_ra>
// kernel: forward.1
= control target key start
LH: loop header
LB: loop body
LE: loop exit
PB: predicated region body
PF: predicated region fallthrough
CT: control target
= control target key end

     0   :  { %16 = vsyncpa [#allocation4], 0  ;;  %s4710_s0 = inlined_call_operand.vmem [shape: f32[2,16,64], index: 0, kind: input, shape index: {}]   ;;  %s4711_s1 = inlined_call_operand.vmem [shape: f32[3,64,112], index: 1, kind: input, shape index: {}]   ;;  %s4712_s2 = inlined_call_operand.vmem [shape: f32[1,112], index: 2, kind: input, shape index: {}]   ;;  %s4713_s3 = inlined_call_operand.vmem [shape: f32[3,112,192], index: 3, kind: input, shape index: {}]   ;;  %s4714_s4 = inlined_call_operand.vmem [shape: f32[1,192], index: 4, kind: input, shape index: {}]   ;;  %s4715_s5 = inlined_call_operand.vmem [shape: f32[2304,64], index: 5, kind: input, shape index: {}]   ;;  %s4716_s6 = inlined_call_operand.vmem [shape: f32[1,64], index: 6, kind: input, shape index: {}]   ;;  %s4717_s7 = inlined_call_operand.vmem [shape: f32[64,64], index: 7, kind: input, shape index: {}]   ;;  %s4718_s8 = inlined_call_operand.vmem [shape: f32[1,64], index: 8, kind: input, shape index: {}]   ;;  %s4719_s9 = inlined_call_operand.vmem [shape: f32[64,6], index: 9, kind: input, shape index: {}]   ;;  %s4720_s10 = inlined_call_operand.vmem [shape: f32[1,6], index: 10, kind: input, shape index: {}]   ;;  %s4721_s11 = inlined_call_operand.hbm [shape: f32[2,1,5], index: 11, kind: output, shape index: {}]  }
   0x1   :  { %18 = vsyncpa [#allocation4 + $0x1], 0  ;;  %s3169_s17 = smov 0   ;;  %s3171_s18 = smov 0  }
   0x2   :  { %s3173_s19 = smov 0   ;;  %s3175_s20 = smov 0  }
   0x3 LB: > { %4723 = sst [smem:[#allocation6_spill]] %s3096_s19  ;;  %s3190_s21 = sadd.s32 4294967295, %s3100_s20   ;;  %s3100_s20 = sphi %s3175_s20, %s4735_s20   ;;  %s3096_s19 = sphi %s3173_s19, %s4732_s19   ;;  %s3092_s18 = sphi %s3171_s18, %s4734_s18   ;;  %s3088_s17 = sphi %s3169_s17, %s4733_s17  }
   0x4   : > { %s2439_s22 = sadd.s32 4294967294, %s3100_s20   ;;  %s3194_s23 = sadd.s32 1, %s3100_s20  }
   0x5   : > { %s267_s24 = sadd.s32 1, %s3096_s19  ;;  %s264_s25 = ssub.s32 %s3100_s20, %s3194_s23 }
   0x6   : > { %p277_p0 = scmp.ne.s32.totalorder %s3096_s19, %s3092_s18  ;;  %p265_p1 = scmp.eq.s32.totalorder %s264_s25, 0 }
   0x7   : > { %p278_p2 = scmp.eq.s32.totalorder %s3190_s21, 1  ;;  %p283_p3 = scmp.ne.s32.totalorder %s3092_s18, %s3088_s17 }
   0x8   : > { %p284_p4 = scmp.eq.s32.totalorder %s2439_s22, 1  ;;  %p2442_p7 = scmp.ge.s32.totalorder %s3100_s20, 1 }
   0x9   : > { %s3205_s26 = scalar_select %p265_p1, %s3096_s19, %s267_s24  }
   0xa   : > { %p3207_p5 = por %p278_p2, %p277_p0  ;;  %p3211_p6 = por %p284_p4, %p283_p3 }
   0xb   : > { %4724 = sst [smem:[#allocation7_spill]] %s3205_s26  ;;  %p340_p8 = scmp.lt.s32.totalorder %s3100_s20, 3 }
   0xd   : > { %p341_p9 = pnand %p2442_p7, %p340_p8 }
   0xe   : > { %p379_p10 = scmp.lt.s32.totalorder (!%p341_p9), %s3190_s21, 1  ;;  %s3107_s13 = smov (!%p341_p9), 127  }
   0xf   : > { %344 = sbr.rel (%p341_p9) target bundleno = 1742 (0x6ce), region = 64  ;;  %s377_s14 = sand.u32 (!%p341_p9), 1, %s3092_s18  }
  0x10   : > { %s2532_s15 = sshll.u32 (!%p341_p9), %s3190_s21, 4  ;;  %s378_s16 = scalar_lea.vmem (!%p341_p9), [#allocation3], %s377_s14 }
  0x11   : > { %s2384_s19 = sshll.u32 (!%p341_p9), %s378_s16, 4  ;;  %s4674_s24 = scalar_lea.hbm (!%p341_p9), %s4721_s11, %s2532_s15  ;;  %s2385_s19 = int_to_ptr.vmem [resolvable:$true] %s2384_s19 }
  0x12   : > { %s2372_s25 = scalar_lea.sflag (!%p341_p9), [#allocation4], %s377_s14  ;;  %s3040_s29 = scalar_lea.vmem (!%p341_p9), %s2385_s19, 16 }
  0x13   : > { %p3041_p11 = scmp.ne.s32.totalorder (!%p341_p9), %s2385_s19, %s3040_s29 }
  0x14   : > { %v2452_v0 = vld [vmem:[%s4711_s1 + $0x78] sm:$0xff]  ;;  %v2451_v2 = vld [vmem:[%s4711_s1 + $0x70] sm:$0xff]  ;;  %v2450_v4 = vld [vmem:[%s4711_s1 + $0x68] sm:$0xff]  ;;  %s380_s12 = scalar_select %p379_p10, %s3190_s21, 1  ;;  %vm405_vm0 = vcmask 1046528   ;;  %vm409_vm1 = vcmask 523264  }
  0x15   : > { %v393_v1 = vld [vmem:[%s4711_s1 + $0x38] sm:$0xff]  ;;  %2899 = vmatprep.subr.mxu0 %v2452_v0  ;;  %v392_v3 = vld [vmem:[%s4711_s1 + $0x30] sm:$0xff]  ;;  %v391_v5 = vld [vmem:[%s4711_s1 + $0x28] sm:$0xff]  ;;  %vm577_vm2 = vcmask 1045504   ;;  %vm735_vm3 = vcmask 916480   ;;  %vm3105_vm8 = vmmov 0   ;;  %p3042_p12 = pnand %p3041_p11, %p3207_p5 }
  0x16   : > { %2918 = vmatprep.subr.mxu1 %v393_v1  ;;  %2900 = vmatpush3.msra.mxu0 %v2452_v0  ;;  %v2449_v6 = vld [vmem:[%s4711_s1 + $0x60] sm:$0xff]  ;;  %s2535_s22 = sshll.u32 %s380_s12, 4  ;;  %v2448_v8 = vld [vmem:[%s4711_s1 + $0x58] sm:$0xff]  ;;  %v2447_v12 = vld [vmem:[%s4711_s1 + $0x50] sm:$0xff]  ;;  %s3104_s12 = smov 64   ;;  %vm2359_vm9 = vcmask 32768  }
  0x17   : > { %2919 = vmatpush3.msra.mxu1 %v393_v1  ;;  %2901 = vmatprep.subr.mxu0 %v2451_v2  ;;  %v390_v7 = vld [vmem:[%s4711_s1 + $0x20] sm:$0xff]  ;;  %s383_s26 = scalar_lea.vmem %s4710_s0, %s2535_s22  ;;  %v389_v9 = vld [vmem:[%s4711_s1 + $0x18] sm:$0xff]  ;;  %v388_v13 = vld [vmem:[%s4711_s1 + $0x10] sm:$0xff]  ;;  %p3043_p13 = pneg %p3042_p12 }
  0x18   : > { %2920 = vmatprep.subr.mxu1 %v392_v3  ;;  %2902 = vmatpush3.msra.mxu0 %v2451_v2  ;;  %v384_v10 = vld [vmem:[%s383_s26] sm:$0xff]  ;;  %v3252_v11 = vld [vmem:[%s383_s26 + $0x8] sm:$0xff]  ;;  %v2464_v23 = vld [vmem:[%s4711_s1 + $0xb8] sm:$0xff] }
  0x19   : > { %2921 = vmatpush3.msra.mxu1 %v392_v3  ;;  %2903 = vmatprep.subr.mxu0 %v2450_v4  ;;  %v406_v14 = vrot.slane %v384_v10, 1  ;;  %v407_v15 = vrot.slane %v3252_v11, 1  ;;  %v2446_v16 = vld [vmem:[%s4711_s1 + $0x48] sm:$0xff]  ;;  %v2445_v18 = vld [vmem:[%s4711_s1 + $0x40] sm:$0xff]  ;;  %v578_v20 = vrot.slane %v384_v10, 2  ;;  %v579_v21 = vrot.slane %v3252_v11, 2 }
  0x1a   : > { %2922 = vmatprep.subr.mxu1 %v391_v5  ;;  %2904 = vmatpush3.msra.mxu0 %v2450_v4  ;;  %v387_v17 = vld [vmem:[%s4711_s1 + $0x8] sm:$0xff]  ;;  %v386_v19 = vld [vmem:[%s4711_s1] sm:$0xff]  ;;  %v2495_v25 = vld [vmem:[%s4713_s3 + $0x1b8] sm:$0xff] }
  0x1b   : > { %2923 = vmatpush3.msra.mxu1 %v391_v5  ;;  %2905 = vmatprep.subr.mxu0 %v2449_v6  ;;  %v408_v22 = vsel %vm405_vm0, %v406_v14, %v407_v15  ;;  %v580_v24 = vsel %vm577_vm2, %v578_v20, %v579_v21  ;;  %v2463_v26 = vld [vmem:[%s4711_s1 + $0xb0] sm:$0xff]  ;;  %v2462_v27 = vld [vmem:[%s4711_s1 + $0xa8] sm:$0xff]  ;;  %v2461_v28 = vld [vmem:[%s4711_s1 + $0xa0] sm:$0xff] }
  0x1c   : > { %2924 = vmatprep.subr.mxu1 %v390_v7  ;;  %2906 = vmatpush3.msra.mxu0 %v2449_v6  ;;  %v2460_v29 = vld [vmem:[%s4711_s1 + $0x98] sm:$0xff]  ;;  %v2459_v30 = vld [vmem:[%s4711_s1 + $0x90] sm:$0xff]  ;;  %v2458_v31 = vld [vmem:[%s4711_s1 + $0x88] sm:$0xff] }
  0x1d   : > { %2925 = vmatpush3.msra.mxu1 %v390_v7  ;;  %2907 = vmatprep.subr.mxu0 %v2448_v8  ;;  %v2457_v32 = vld [vmem:[%s4711_s1 + $0x80] sm:$0xff]  ;;  %v700_v33 = vld [vmem:[%s4713_s3 + $0xd8] sm:$0xff]  ;;  %v699_v34 = vld [vmem:[%s4713_s3 + $0xd0] sm:$0xff] }
  0x1e   : > { %2926 = vmatprep.subr.mxu1 %v389_v9  ;;  %2908 = vmatpush3.msra.mxu0 %v2448_v8  ;;  %v698_v35 = vld [vmem:[%s4713_s3 + $0xc8] sm:$0xff]  ;;  %v2494_v36 = vld [vmem:[%s4713_s3 + $0x1b0] sm:$0xff]  ;;  %v697_v37 = vld [vmem:[%s4713_s3 + $0xc0] sm:$0xff] }
  0x1f   : > { %2927 = vmatpush3.msra.mxu1 %v389_v9  ;;  %2909 = vmatprep.subr.mxu0 %v2447_v12  ;;  %v2493_v38 = vld [vmem:[%s4713_s3 + $0x1a8] sm:$0xff]  ;;  %v696_v39 = vld [vmem:[%s4713_s3 + $0xb8] sm:$0xff]  ;;  %v2492_v40 = vld [vmem:[%s4713_s3 + $0x1a0] sm:$0xff] }
  0x20   : > { %2928 = vmatprep.subr.mxu1 %v388_v13  ;;  %2910 = vmatpush3.msra.mxu0 %v2447_v12  ;;  %v695_v41 = vld [vmem:[%s4713_s3 + $0xb0] sm:$0xff]  ;;  %v2491_v42 = vld [vmem:[%s4713_s3 + $0x198] sm:$0xff]  ;;  %v694_v43 = vld [vmem:[%s4713_s3 + $0xa8] sm:$0xff] }
  0x21   : > { %2929 = vmatpush3.msra.mxu1 %v388_v13  ;;  %2911 = vmatprep.subr.mxu0 %v2446_v16  ;;  %v2490_v44 = vld [vmem:[%s4713_s3 + $0x190] sm:$0xff]  ;;  %v693_v45 = vld [vmem:[%s4713_s3 + $0xa0] sm:$0xff]  ;;  %v2489_v46 = vld [vmem:[%s4713_s3 + $0x188] sm:$0xff] }
  0x22   : > { %2930 = vmatprep.subr.mxu1 %v387_v17  ;;  %2912 = vmatpush3.msra.mxu0 %v2446_v16  ;;  %v692_v47 = vld [vmem:[%s4713_s3 + $0x98] sm:$0xff]  ;;  %v2488_v48 = vld [vmem:[%s4713_s3 + $0x180] sm:$0xff]  ;;  %v691_v49 = vld [vmem:[%s4713_s3 + $0x90] sm:$0xff] }
  0x23   : > { %2931 = vmatpush3.msra.mxu1 %v387_v17  ;;  %2913 = vmatprep.subr.mxu0 %v2445_v18  ;;  %v2487_v50 = vld [vmem:[%s4713_s3 + $0x178] sm:$0xff]  ;;  %v690_v51 = vld [vmem:[%s4713_s3 + $0x88] sm:$0xff]  ;;  %v2486_v52 = vld [vmem:[%s4713_s3 + $0x170] sm:$0xff] }
  0x24   : > { %2932 = vmatprep.subr.mxu1 %v386_v19  ;;  %2914 = vmatpush3.msra.mxu0 %v2445_v18  ;;  %v689_v53 = vld [vmem:[%s4713_s3 + $0x80] sm:$0xff]  ;;  %v2485_v54 = vld [vmem:[%s4713_s3 + $0x168] sm:$0xff]  ;;  %v688_v55 = vld [vmem:[%s4713_s3 + $0x78] sm:$0xff] }
  0x25   : > { %2915 = vmatprep.mubr.msk.f32.mxu0 %vm409_vm1, %v408_v22  ;;  %2933 = vmatpush3.msra.mxu1 %v386_v19  ;;  %v2484_v56 = vld [vmem:[%s4713_s3 + $0x160] sm:$0xff]  ;;  %v687_v57 = vld [vmem:[%s4713_s3 + $0x70] sm:$0xff]  ;;  %v2483_v58 = vld [vmem:[%s4713_s3 + $0x158] sm:$0xff] }
  0x26   : > { %2934 = vmatprep.mubr.msk.f32.mxu1 %vm409_vm1, %v384_v10  ;;  %2916 = vmatmul.mubr.msk.f32.vlgmr.msra.gmra.mxu0 %vm409_vm1, %v407_v15  ;;  %v686_v59 = vld [vmem:[%s4713_s3 + $0x68] sm:$0xff]  ;;  %v2482_v60 = vld [vmem:[%s4713_s3 + $0x150] sm:$0xff]  ;;  %v685_v61 = vld [vmem:[%s4713_s3 + $0x60] sm:$0xff] }
  0x27   : > { %2935 = vmatmul.mubr.msk.f32.vlgmr.msra.gmra.mxu1 %vm409_vm1, %v3252_v11  ;;  %2937 = vmatprep.subr.mxu0 %v2464_v23  ;;  %v2481_v62 = vld [vmem:[%s4713_s3 + $0x148] sm:$0xff]  ;;  %v684_v63 = vld [vmem:[%s4713_s3 + $0x58] sm:$0xff]  ;;  %v2480_v0 = vld [vmem:[%s4713_s3 + $0x140] sm:$0xff] }
  0x28   : > { %2953 = vmatprep.mubr.msk.f32.mxu0 %vm409_vm1, %v580_v24  ;;  %2938 = vmatpush3.msra.mxu0 %v2464_v23  ;;  %v683_v1 = vld [vmem:[%s4713_s3 + $0x50] sm:$0xff]  ;;  %v2479_v2 = vld [vmem:[%s4713_s3 + $0x138] sm:$0xff]  ;;  %v682_v3 = vld [vmem:[%s4713_s3 + $0x48] sm:$0xff]  ;;  %v3102_v23 = vmov 0.0  }
  0x29   : > { %744 = vmatprep.subr.mxu1 %v2495_v25  ;;  %2939 = vmatprep.subr.mxu0 %v2463_v26  ;;  %v2478_v4 = vld [vmem:[%s4713_s3 + $0x130] sm:$0xff]  ;;  %v681_v5 = vld [vmem:[%s4713_s3 + $0x40] sm:$0xff]  ;;  %v2477_v6 = vld [vmem:[%s4713_s3 + $0x128] sm:$0xff] }
  0x2a   : > { %2940 = vmatpush3.msra.mxu0 %v2463_v26  ;;  %745 = vmatpush1.msra.mxu1 %v2494_v36  ;;  %v680_v7 = vld [vmem:[%s4713_s3 + $0x38] sm:$0xff]  ;;  %v2476_v8 = vld [vmem:[%s4713_s3 + $0x120] sm:$0xff]  ;;  %v679_v9 = vld [vmem:[%s4713_s3 + $0x30] sm:$0xff] }
  0x2b   : > { %2941 = vmatprep.subr.mxu0 %v2462_v27  ;;  %746 = vmatprep.subr.mxu1 %v2493_v38  ;;  %v2475_v10 = vld [vmem:[%s4713_s3 + $0x118] sm:$0xff]  ;;  %v678_v11 = vld [vmem:[%s4713_s3 + $0x28] sm:$0xff]  ;;  %v2474_v12 = vld [vmem:[%s4713_s3 + $0x110] sm:$0xff] }
  0x2c   : > { %2942 = vmatpush3.msra.mxu0 %v2462_v27  ;;  %747 = vmatpush1.msra.mxu1 %v2492_v40  ;;  %v677_v13 = vld [vmem:[%s4713_s3 + $0x20] sm:$0xff]  ;;  %v2473_v14 = vld [vmem:[%s4713_s3 + $0x108] sm:$0xff]  ;;  %v676_v15 = vld [vmem:[%s4713_s3 + $0x18] sm:$0xff] }
  0x2d   : > { %2943 = vmatprep.subr.mxu0 %v2461_v28  ;;  %748 = vmatprep.subr.mxu1 %v2491_v42  ;;  %v2472_v16 = vld [vmem:[%s4713_s3 + $0x100] sm:$0xff]  ;;  %v675_v17 = vld [vmem:[%s4713_s3 + $0x10] sm:$0xff]  ;;  %v2471_v18 = vld [vmem:[%s4713_s3 + $0xf8] sm:$0xff] }
  0x2e   : > { %2944 = vmatpush3.msra.mxu0 %v2461_v28  ;;  %749 = vmatpush1.msra.mxu1 %v2490_v44  ;;  %v674_v19 = vld [vmem:[%s4713_s3 + $0x8] sm:$0xff]  ;;  %v2470_v20 = vld [vmem:[%s4713_s3 + $0xf0] sm:$0xff]  ;;  %v2468_v24 = vld [vmem:[%s4713_s3 + $0xe0] sm:$0xff] }
  0x2f   : > { %2945 = vmatprep.subr.mxu0 %v2460_v29  ;;  %750 = vmatprep.subr.mxu1 %v2489_v46  ;;  %v2469_v22 = vld [vmem:[%s4713_s3 + $0xe8] sm:$0xff]  ;;  %v2527_v25 = vld [vmem:[%s4713_s3 + $0x298] sm:$0xff]  ;;  %v2524_v46 = vld [vmem:[%s4713_s3 + $0x280] sm:$0xff] }
  0x30   : > { %2946 = vmatpush3.msra.mxu0 %v2460_v29  ;;  %751 = vmatpush1.msra.mxu1 %v2488_v48  ;;  %v2522_v48 = vld [vmem:[%s4713_s3 + $0x270] sm:$0xff] }
  0x31   : > { %2947 = vmatprep.subr.mxu0 %v2459_v30  ;;  %752 = vmatprep.subr.mxu1 %v2487_v50  ;;  %v2520_v50 = vld [vmem:[%s4713_s3 + $0x260] sm:$0xff] }
  0x32   : > { %2948 = vmatpush3.msra.mxu0 %v2459_v30  ;;  %753 = vmatpush1.msra.mxu1 %v2486_v52  ;;  %v2518_v52 = vld [vmem:[%s4713_s3 + $0x250] sm:$0xff] }
  0x33   : > { %2949 = vmatprep.subr.mxu0 %v2458_v31  ;;  %754 = vmatprep.subr.mxu1 %v2485_v54  ;;  %v2516_v54 = vld [vmem:[%s4713_s3 + $0x240] sm:$0xff] }
  0x34   : > { %2950 = vmatpush3.msra.mxu0 %v2458_v31  ;;  %755 = vmatpush1.msra.mxu1 %v2484_v56  ;;  %v2514_v56 = vld [vmem:[%s4713_s3 + $0x230] sm:$0xff] }
  0x35   : > { %2951 = vmatprep.subr.mxu0 %v2457_v32  ;;  %756 = vmatprep.subr.mxu1 %v2483_v58  ;;  %v2512_v58 = vld [vmem:[%s4713_s3 + $0x220] sm:$0xff] }
  0x36   : > { %2952 = vmatpush3.msra.mxu0 %v2457_v32  ;;  %757 = vmatpush1.msra.mxu1 %v2482_v60  ;;  %v2467_v32 = vld [vmem:[%s4712_s2] ss:$0 sm:$0xff]  ;;  %v2510_v60 = vld [vmem:[%s4713_s3 + $0x210] sm:$0xff] }
  0x37   : > { %2954 = vmatmul.mubr.msk.f32.vlgmr.msra.gmra.mxu0 %vm409_vm1, %v579_v21  ;;  %825 = vmatprep.subr.mxu0 %v700_v33  ;;  %v673_v21 = vld [vmem:[%s4713_s3] sm:$0xff] }
  0x38   : > { %826 = vmatpush1.msra.mxu0 %v699_v34  ;;  %758 = vmatprep.subr.mxu1 %v2481_v62  ;;  %v2508_v62 = vld [vmem:[%s4713_s3 + $0x200] sm:$0xff] }
  0x39   : > { %827 = vmatprep.subr.mxu0 %v698_v35  ;;  %759 = vmatpush1.msra.mxu1 %v2480_v0  ;;  %v2506_v0 = vld [vmem:[%s4713_s3 + $0x1f0] sm:$0xff] }
  0x3a   : > { %828 = vmatpush1.msra.mxu0 %v697_v37  ;;  %760 = vmatprep.subr.mxu1 %v2479_v2  ;;  %v2504_v2 = vld [vmem:[%s4713_s3 + $0x1e0] sm:$0xff] }
  0x3b   : > { %829 = vmatprep.subr.mxu0 %v696_v39  ;;  %761 = vmatpush1.msra.mxu1 %v2478_v4  ;;  %v2502_v4 = vld [vmem:[%s4713_s3 + $0x1d0] sm:$0xff] }
  0x3c   : > { %830 = vmatpush1.msra.mxu0 %v695_v41  ;;  %762 = vmatprep.subr.mxu1 %v2477_v6  ;;  %v2501_v6 = vld [vmem:[%s4713_s3 + $0x1c8] sm:$0xff] }
  0x3d   : > { %831 = vmatprep.subr.mxu0 %v694_v43  ;;  %763 = vmatpush1.msra.mxu1 %v2476_v8  ;;  %v2526_v43 = vld [vmem:[%s4713_s3 + $0x290] sm:$0xff] }
  0x3e   : > { %832 = vmatpush1.msra.mxu0 %v693_v45  ;;  %764 = vmatprep.subr.mxu1 %v2475_v10  ;;  %v2525_v45 = vld [vmem:[%s4713_s3 + $0x288] sm:$0xff]  ;;  %v1203_v10 = vld [vmem:[%s4715_s5 + $0xf8] sm:$0xff] }
  0x3f   : > { %833 = vmatprep.subr.mxu0 %v692_v47  ;;  %765 = vmatpush1.msra.mxu1 %v2474_v12  ;;  %v2523_v47 = vld [vmem:[%s4713_s3 + $0x278] sm:$0xff] }
  0x40   : > { %834 = vmatpush1.msra.mxu0 %v691_v49  ;;  %766 = vmatprep.subr.mxu1 %v2473_v14  ;;  %v2521_v49 = vld [vmem:[%s4713_s3 + $0x268] sm:$0xff]  ;;  %v1187_v12 = vld [vmem:[%s4715_s5 + $0x78] sm:$0xff]  ;;  %v1202_v14 = vld [vmem:[%s4715_s5 + $0xf0] sm:$0xff] }
  0x41   : > { %835 = vmatprep.subr.mxu0 %v690_v51  ;;  %767 = vmatpush1.msra.mxu1 %v2472_v16  ;;  %v2519_v51 = vld [vmem:[%s4713_s3 + $0x258] sm:$0xff]  ;;  %v1186_v16 = vld [vmem:[%s4715_s5 + $0x70] sm:$0xff] }
  0x42   : > { %836 = vmatpush1.msra.mxu0 %v689_v53  ;;  %768 = vmatprep.subr.mxu1 %v2471_v18  ;;  %v2517_v53 = vld [vmem:[%s4713_s3 + $0x248] sm:$0xff] }
  0x43   : > { %837 = vmatprep.subr.mxu0 %v688_v55  ;;  %769 = vmatpush1.msra.mxu1 %v2470_v20  ;;  %v2515_v55 = vld [vmem:[%s4713_s3 + $0x238] sm:$0xff]  ;;  %v1201_v18 = vld [vmem:[%s4715_s5 + $0xe8] sm:$0xff] }
  0x44   : > { %838 = vmatpush1.msra.mxu0 %v687_v57  ;;  %885 = vmatprep.mubr.f32.mxu0 %v3102_v23  ;;  %v2513_v57 = vld [vmem:[%s4713_s3 + $0x228] sm:$0xff] }
  0x45   : > { %839 = vmatprep.subr.mxu0 %v686_v59  ;;  %770 = vmatprep.subr.mxu1 %v2469_v22  ;;  %v2511_v59 = vld [vmem:[%s4713_s3 + $0x218] sm:$0xff]  ;;  %v1185_v20 = vld [vmem:[%s4715_s5 + $0x68] sm:$0xff]  ;;  %v1200_v22 = vld [vmem:[%s4715_s5 + $0xe0] sm:$0xff] }
  0x46   : > { %840 = vmatpush1.msra.mxu0 %v685_v61  ;;  %771 = vmatpush1.msra.mxu1 %v2468_v24  ;;  %v2509_v61 = vld [vmem:[%s4713_s3 + $0x208] sm:$0xff]  ;;  %v1232_v24 = vld [vmem:[%s4715_s5 + $0x1e0] sm:$0xff] }
  0x47   : > { %841 = vmatprep.subr.mxu0 %v684_v63  ;;  %804 = vmatprep.mubr.f32.mxu1 %v3102_v23  ;;  %v2507_v63 = vld [vmem:[%s4713_s3 + $0x1f8] sm:$0xff] }
  0x48   : > { %842 = vmatpush1.msra.mxu0 %v683_v1  ;;  %938 = vmatprep.subr.mxu1 %v2527_v25  ;;  %v2505_v1 = vld [vmem:[%s4713_s3 + $0x1e8] sm:$0xff]  ;;  %v1184_v25 = vld [vmem:[%s4715_s5 + $0x60] sm:$0xff] }
  0x49   : > { %843 = vmatprep.subr.mxu0 %v682_v3  ;;  %v2503_v3 = vld [vmem:[%s4713_s3 + $0x1d8] sm:$0xff] }
  0x4a   : > { %844 = vmatpush1.msra.mxu0 %v681_v5 }
  0x4b   : > { %845 = vmatprep.subr.mxu0 %v680_v7  ;;  %v2500_v7 = vld [vmem:[%s4713_s3 + $0x1c0] sm:$0xff] }
  0x4c   : > { %846 = vmatpush1.msra.mxu0 %v679_v9 }
  0x4d   : > { %847 = vmatprep.subr.mxu0 %v678_v11  ;;  %v1235_v11 = vld [vmem:[%s4715_s5 + $0x1f8] sm:$0xff] }
  0x4e   : > { %848 = vmatpush1.msra.mxu0 %v677_v13  ;;  %v1219_v13 = vld [vmem:[%s4715_s5 + $0x178] sm:$0xff] }
  0x4f   : > { %849 = vmatprep.subr.mxu0 %v676_v15  ;;  %v1234_v15 = vld [vmem:[%s4715_s5 + $0x1f0] sm:$0xff] }
  0x50   : > { %850 = vmatpush1.msra.mxu0 %v675_v17  ;;  %v1218_v17 = vld [vmem:[%s4715_s5 + $0x170] sm:$0xff] }
  0x51   : > { %851 = vmatprep.subr.mxu0 %v674_v19  ;;  %v1233_v19 = vld [vmem:[%s4715_s5 + $0x1e8] sm:$0xff] }
  0x52   : > { %852 = vmatpush1.msra.mxu0 %v673_v21  ;;  %v1217_v21 = vld [vmem:[%s4715_s5 + $0x168] sm:$0xff] }
  0x53   : > { %2566 = vmatprep.subr.mxu0 %v1203_v10  ;;  %v1227_v10 = vld [vmem:[%s4715_s5 + $0x1b8] sm:$0xff] }
  0xe6   : > { %v2917_v26 = vpop.f32.mrf.mxu0 }
  0xe7   : > { %v2936_v27 = vpop.f32.mrf.mxu1 }
  0xe8   : > { %v480_v28 = vpop.f32.mrf.mxu0  ;;  %v565_v30 = vadd.f32 %v2936_v27, %v2917_v26  ;;  %v1216_v26 = vld [vmem:[%s4715_s5 + $0x160] sm:$0xff]  ;;  %v1199_v27 = vld [vmem:[%s4715_s5 + $0xd8] sm:$0xff] }
  0xe9   : > { %v559_v29 = vpop.f32.mrf.mxu1 }
  0xea   : > { %v560_v33 = vadd.f32 %v559_v29, %v480_v28  ;;  %v1231_v28 = vld [vmem:[%s4715_s5 + $0x1d8] sm:$0xff] }
  0xeb   : > { %v1183_v29 = vld [vmem:[%s4715_s5 + $0x58] sm:$0xff] }
  0xf7   : > { %v2955_v31 = vpop.f32.mrf.mxu0 }
  0xf8   : > { %v661_v34 = vadd.f32 %v2955_v31, %v565_v30  ;;  %v1215_v30 = vld [vmem:[%s4715_s5 + $0x158] sm:$0xff]  ;;  %v1198_v31 = vld [vmem:[%s4715_s5 + $0xd0] sm:$0xff] }
  0xf9   : > { %v651_v35 = vpop.f32.mrf.mxu0 }
  0xfa   : > { %v670_v36 = vadd.f32 %v2467_v32, %v661_v34  ;;  %v660_v37 = vadd.f32 %v651_v35, %v560_v33  ;;  %v1182_v33 = vld [vmem:[%s4715_s5 + $0x50] sm:$0xff]  ;;  %v1197_v35 = vld [vmem:[%s4715_s5 + $0xc8] sm:$0xff] }
  0xfb   : > { %v1214_v34 = vld [vmem:[%s4715_s5 + $0x150] sm:$0xff] }
  0xfc   : > { %v3483_v38 = vmax.f32 %v670_v36, 0.0  ;;  %v669_v39 = vadd.f32 %v2467_v32, %v660_v37  ;;  %v1230_v32 = vld [vmem:[%s4715_s5 + $0x1d0] sm:$0xff]  ;;  %v1229_v36 = vld [vmem:[%s4715_s5 + $0x1c8] sm:$0xff] }
  0xfd   : > { %v1181_v37 = vld [vmem:[%s4715_s5 + $0x48] sm:$0xff] }
  0xfe   : > { %v3485_v40 = vmax.f32 %v669_v39, 0.0  ;;  %v733_v41 = vrot.slane %v3483_v38, 1  ;;  %v928_v8 = vrot.slane %v3483_v38, 2  ;;  %v1196_v39 = vld [vmem:[%s4715_s5 + $0xc0] sm:$0xff] }
 0x100   : > { %v732_v42 = vrot.slane %v3485_v40, 1  ;;  %2498 = vmatmul.mubr.msk.f32.vlgmr.msra.gmra.mxu0 %vm735_vm3, %v3485_v40  ;;  %v927_v5 = vrot.slane %v3485_v40, 2  ;;  %v1228_v40 = vld [vmem:[%s4715_s5 + $0x1c0] sm:$0xff] }
 0x101   : > { %891 = vmatprep.mubr.f32.mxu0 %v3102_v23  ;;  %2567 = vmatpush3.msra.mxu0 %v1187_v12 }
 0x102   : > { %v734_v44 = vsel %vm405_vm0, %v732_v42, %v733_v41  ;;  %v929_v9 = vsel %vm577_vm2, %v927_v5, %v928_v8  ;;  %2568 = vmatprep.subr.mxu0 %v1202_v14  ;;  %v1017_v42 = vlaneseq  ;;  %v1212_v5 = vld [vmem:[%s4715_s5 + $0x140] sm:$0xff]  ;;  %v1211_v14 = vld [vmem:[%s4715_s5 + $0x138] sm:$0xff] }
 0x103   : > { %2496 = vmatmul.mubr.msk.f32.vlgmr.msra.gmra.mxu1 %vm735_vm3, %v734_v44  ;;  %2569 = vmatpush3.msra.mxu0 %v1186_v16 }
 0x104   : > { %939 = vmatpush1.msra.mxu1 %v2526_v43  ;;  %2499 = vmatmul.mubr.msk.f32.gmra.mxu0 %vm735_vm3, %v3483_v38  ;;  %v1213_v38 = vld [vmem:[%s4715_s5 + $0x148] sm:$0xff]  ;;  %v3677_v44 = vshrl.u32 %v1017_v42, 7  ;;  %vm3744_vm4 = vcmp.lt.s32.totalorder %v1017_v42, 192  ;;  %vm1071_vm5 = vcmp.ge.s32.totalorder %v1017_v42, 64  ;;  %vm1072_vm6 = vcmp.lt.s32.totalorder %v1017_v42, 256 }
 0x105   : > { %940 = vmatprep.subr.mxu1 %v2525_v45  ;;  %810 = vmatprep.mubr.f32.mxu1 %v3102_v23  ;;  %vm3835_vm7 = vmand %vm1071_vm5, %vm1072_vm6 }
 0x106   : > { %941 = vmatpush1.msra.mxu1 %v2524_v46  ;;  %2570 = vmatprep.subr.mxu0 %v1201_v18 }
 0x107   : > { %942 = vmatprep.subr.mxu1 %v2523_v47  ;;  %2497 = vmatmul.mubr.msk.f32.gmra.mxu1 %vm735_vm3, %v733_v41  ;;  %v3680_v47 = vsub.s32 0, %v3677_v44 }
 0x108   : > { %943 = vmatpush1.msra.mxu1 %v2522_v48  ;;  %998 = vmatprep.mubr.f32.mxu1 %v3102_v23 }
 0x109   : > { %944 = vmatprep.subr.mxu1 %v2521_v49  ;;  %2571 = vmatpush3.msra.mxu0 %v1185_v20  ;;  %v1015_v49 = vld [vmem:[%s4714_s4] sm:$0x3]  ;;  %v1226_v20 = vld [vmem:[%s4715_s5 + $0x1b0] sm:$0xff] }
 0x10a   : > { %945 = vmatpush1.msra.mxu1 %v2520_v50  ;;  %2572 = vmatprep.subr.mxu0 %v1200_v22  ;;  %v3686_v50 = vsub.s32 1, %v3677_v44  ;;  %v1210_v22 = vld [vmem:[%s4715_s5 + $0x130] sm:$0xff] }
 0x10b   : > { %946 = vmatprep.subr.mxu1 %v2519_v51  ;;  %2573 = vmatpush3.msra.mxu0 %v1184_v25 }
 0x10c   : > { %947 = vmatpush1.msra.mxu1 %v2518_v52  ;;  %2574 = vmatprep.subr.mxu0 %v1199_v27  ;;  %v3103_v52 = vmov 1966171168   ;;  %v1193_v27 = vld [vmem:[%s4715_s5 + $0xa8] sm:$0xff] }
 0x10d   : > { %948 = vmatprep.subr.mxu1 %v2517_v53  ;;  %2575 = vmatpush3.msra.mxu0 %v1183_v29  ;;  %v1039_v53 = vunpack.c.l.s4 %v3103_v52  ;;  %v1177_v29 = vld [vmem:[%s4715_s5 + $0x28] sm:$0xff]  ;;  %v1207_v52 = vld [vmem:[%s4715_s5 + $0x118] sm:$0xff] }
 0x10e   : > { %949 = vmatpush1.msra.mxu1 %v2516_v54  ;;  %2576 = vmatprep.subr.mxu0 %v1198_v31 }
 0x10f   : > { %950 = vmatprep.subr.mxu1 %v2515_v55  ;;  %2577 = vmatpush3.msra.mxu0 %v1182_v33  ;;  %v1020_v55 = vrot.slane %v1015_v49, %v3680_v47 }
 0x110   : > { %951 = vmatpush1.msra.mxu1 %v2514_v56  ;;  %2578 = vmatprep.subr.mxu0 %v1197_v35  ;;  %v1192_v35 = vld [vmem:[%s4715_s5 + $0xa0] sm:$0xff] }
 0x111   : > { %952 = vmatprep.subr.mxu1 %v2513_v57  ;;  %2579 = vmatpush3.msra.mxu0 %v1181_v37  ;;  %v1486_v37 = vsub.s32 5, %v3677_v44 }
 0x112   : > { %953 = vmatpush1.msra.mxu1 %v2512_v58  ;;  %2580 = vmatprep.subr.mxu0 %v1196_v39  ;;  %v1208_v39 = vld [vmem:[%s4715_s5 + $0x120] sm:$0xff] }
 0x113   : > { %954 = vmatprep.subr.mxu1 %v2511_v59 }
 0x114   : > { %955 = vmatpush1.msra.mxu1 %v2510_v60  ;;  %v1024_v60 = vrot.slane %v1015_v49, %v3686_v50 }
 0x115   : > { %956 = vmatprep.subr.mxu1 %v2509_v61 }
 0x116   : > { %957 = vmatpush1.msra.mxu1 %v2508_v62  ;;  %v1040_v62 = vunpack.c.0.s8 %v1039_v53 }
 0x117   : > { %958 = vmatprep.subr.mxu1 %v2507_v63 }
 0x118   : > { %959 = vmatpush1.msra.mxu1 %v2506_v0  ;;  %v3703_v12 = vsub.s32 %v1040_v62, %v3677_v44 }
 0x119   : > { %960 = vmatprep.subr.mxu1 %v2505_v1 }
 0x11a   : > { %961 = vmatpush1.msra.mxu1 %v2504_v2 }
 0x11b   : > { %962 = vmatprep.subr.mxu1 %v2503_v3 }
 0x11c   : > { %963 = vmatpush1.msra.mxu1 %v2502_v4  ;;  %v1180_v4 = vld [vmem:[%s4715_s5 + $0x40] sm:$0xff] }
 0x11d   : > { %964 = vmatprep.subr.mxu1 %v2501_v6  ;;  %2581 = vmatpush3.msra.mxu0 %v1180_v4 }
 0x11e   : > { %965 = vmatpush1.msra.mxu1 %v2500_v7 }
 0x11f   : > { %2528 = vmatmul.mubr.msk.f32.vlgmr.msra.gmra.mxu1 %vm735_vm3, %v929_v9  ;;  %2601 = vmatprep.subr.mxu1 %v1235_v11  ;;  %v1195_v9 = vld [vmem:[%s4715_s5 + $0xb8] sm:$0xff] }
 0x120   : > { %1004 = vmatprep.mubr.f32.mxu1 %v3102_v23  ;;  %2602 = vmatpush3.msra.mxu1 %v1219_v13  ;;  %v1179_v13 = vld [vmem:[%s4715_s5 + $0x38] sm:$0xff] }
 0x121   : > { %2603 = vmatprep.subr.mxu1 %v1234_v15  ;;  %2582 = vmatprep.subr.mxu0 %v1195_v9  ;;  %v1220_v9 = vld [vmem:[%s4715_s5 + $0x180] sm:$0xff] }
 0x122   : > { %2604 = vmatpush3.msra.mxu1 %v1218_v17  ;;  %2583 = vmatpush3.msra.mxu0 %v1179_v13  ;;  %v1267_v13 = vld [vmem:[%s4715_s5 + $0x2f8] sm:$0xff] }
 0x123   : > { %2529 = vmatmul.mubr.msk.f32.gmra.mxu1 %vm735_vm3, %v928_v8  ;;  %2605 = vmatprep.subr.mxu1 %v1233_v19  ;;  %v1194_v19 = vld [vmem:[%s4715_s5 + $0xb0] sm:$0xff] }
 0x124   : > { %2606 = vmatpush3.msra.mxu1 %v1217_v21  ;;  %2584 = vmatprep.subr.mxu0 %v1194_v19  ;;  %v1178_v21 = vld [vmem:[%s4715_s5 + $0x30] sm:$0xff] }
 0x125   : > { %2607 = vmatprep.subr.mxu1 %v1232_v24  ;;  %2585 = vmatpush3.msra.mxu0 %v1178_v21 }
 0x126   : > { %2608 = vmatpush3.msra.mxu1 %v1216_v26  ;;  %2586 = vmatprep.subr.mxu0 %v1193_v27 }
 0x127   : > { %2609 = vmatprep.subr.mxu1 %v1231_v28  ;;  %v1225_v28 = vld [vmem:[%s4715_s5 + $0x1a8] sm:$0xff]  ;;  %2587 = vmatpush3.msra.mxu0 %v1177_v29 }
 0x128   : > { %2610 = vmatpush3.msra.mxu1 %v1215_v30  ;;  %v1209_v30 = vld [vmem:[%s4715_s5 + $0x128] sm:$0xff]  ;;  %2588 = vmatprep.subr.mxu0 %v1192_v35  ;;  %v1474_v35 = vsub.s32 2, %v3677_v44 }
 0x129   : > { %2611 = vmatprep.subr.mxu1 %v1230_v32 }
 0x12a   : > { %2612 = vmatpush3.msra.mxu1 %v1214_v34 }
 0x12b   : > { %2613 = vmatprep.subr.mxu1 %v1229_v36  ;;  %v1224_v36 = vld [vmem:[%s4715_s5 + $0x1a0] sm:$0xff] }
 0x12c   : > { %2614 = vmatpush3.msra.mxu1 %v1213_v38  ;;  %v1176_v38 = vld [vmem:[%s4715_s5 + $0x20] sm:$0xff] }
 0x12d   : > { %2615 = vmatprep.subr.mxu1 %v1228_v40  ;;  %2589 = vmatpush3.msra.mxu0 %v1176_v38  ;;  %v1494_v38 = vsub.s32 7, %v3677_v44 }
 0x12e   : > { %2616 = vmatpush3.msra.mxu1 %v1212_v5  ;;  %v1173_v5 = vld [vmem:[%s4715_s5 + $0x8] sm:$0xff] }
 0x12f   : > { %2617 = vmatprep.subr.mxu1 %v1227_v10  ;;  %v1172_v10 = vld [vmem:[%s4715_s5] sm:$0xff] }
 0x130   : > { %2618 = vmatpush3.msra.mxu1 %v1211_v14  ;;  %v1299_v14 = vld [vmem:[%s4715_s5 + $0x3f8] sm:$0xff] }
 0x131   : > { %2619 = vmatprep.subr.mxu1 %v1226_v20 }
 0x132   : > { %2620 = vmatpush3.msra.mxu1 %v1210_v22 }
 0x133   : > { %2621 = vmatprep.subr.mxu1 %v1225_v28 }
 0x134   : > { %2622 = vmatpush3.msra.mxu1 %v1209_v30 }
 0x135   : > { %2623 = vmatprep.subr.mxu1 %v1224_v36 }
 0x136   : > { %2624 = vmatpush3.msra.mxu1 %v1208_v39 }
 0x1c0   : > { %v887_v45 = vpop.f32.mrf.mxu0 }
 0x1c2   : > { %v889_v48 = vpop.f32.mrf.mxu0 }
 0x1c3   : > { %v806_v41 = vpop.f32.mrf.mxu1 }
 0x1c4   : > { %v888_v54 = vadd.f32 %v887_v45, %v806_v41  ;;  %v893_v56 = vpop.f32.mrf.mxu0 }
 0x1c5   : > { %v808_v43 = vpop.f32.mrf.mxu1 }
 0x1c6   : > { %v890_v58 = vadd.f32 %v889_v48, %v808_v43  ;;  %v895_v2 = vpop.f32.mrf.mxu0  ;;  %v1223_v48 = vld [vmem:[%s4715_s5 + $0x198] sm:$0xff] }
 0x1c7   : > { %v812_v46 = vpop.f32.mrf.mxu1  ;;  %2625 = vmatprep.subr.mxu1 %v1223_v48  ;;  %v1266_v48 = vld [vmem:[%s4715_s5 + $0x2f0] sm:$0xff] }
 0x1c8   : > { %v894_v63 = vadd.f32 %v893_v56, %v812_v46  ;;  %v1191_v46 = vld [vmem:[%s4715_s5 + $0x98] sm:$0xff]  ;;  %2626 = vmatpush3.msra.mxu1 %v1207_v52 }
 0x1c9   : > { %v814_v51 = vpop.f32.mrf.mxu1  ;;  %2590 = vmatprep.subr.mxu0 %v1191_v46  ;;  %v1283_v46 = vld [vmem:[%s4715_s5 + $0x378] sm:$0xff] }
 0x1ca   : > { %v896_v6 = vadd.f32 %v895_v2, %v814_v51  ;;  %v1175_v51 = vld [vmem:[%s4715_s5 + $0x18] sm:$0xff] }
 0x1cb   : > { %2591 = vmatpush3.msra.mxu0 %v1175_v51  ;;  %v1298_v51 = vld [vmem:[%s4715_s5 + $0x3f0] sm:$0xff] }
 0x1df   : > { %v1000_v57 = vpop.f32.mrf.mxu1 }
 0x1e0   : > { %v1011_v59 = vadd.f32 %v1000_v57, %v888_v54  ;;  %v1190_v57 = vld [vmem:[%s4715_s5 + $0x90] sm:$0xff] }
 0x1e1   : > { %v1002_v61 = vpop.f32.mrf.mxu1  ;;  %2592 = vmatprep.subr.mxu0 %v1190_v57  ;;  %v1490_v57 = vsub.s32 6, %v3677_v44 }
 0x1e2   : > { %v1027_v0 = vadd.f32 %v1020_v55, %v1011_v59  ;;  %v1012_v1 = vadd.f32 %v1002_v61, %v890_v58  ;;  %v1222_v58 = vld [vmem:[%s4715_s5 + $0x190] sm:$0xff] }
 0x1e3   : > { %v1006_v3 = vpop.f32.mrf.mxu1  ;;  %v1206_v61 = vld [vmem:[%s4715_s5 + $0x110] sm:$0xff]  ;;  %2627 = vmatprep.subr.mxu1 %v1222_v58  ;;  %v1265_v58 = vld [vmem:[%s4715_s5 + $0x2e8] sm:$0xff] }
 0x1e4   : > { %v1028_v7 = vadd.f32 %v1024_v60, %v1012_v1  ;;  %v1013_v8 = vadd.f32 %v1006_v3, %v894_v63  ;;  %v1031_v15 = vmax.f32 %v1027_v0, 0.0  ;;  %v1189_v63 = vld [vmem:[%s4715_s5 + $0x88] sm:$0xff]  ;;  %2628 = vmatpush3.msra.mxu1 %v1206_v61 }
 0x1e5   : > { %v1008_v11 = vpop.f32.mrf.mxu1  ;;  %v1221_v0 = vld [vmem:[%s4715_s5 + $0x188] sm:$0xff] }
 0x1e6   : > { %v1032_v16 = vmax.f32 %v1028_v7, 0.0  ;;  %v1029_v17 = vadd.f32 %v1020_v55, %v1013_v8  ;;  %v1014_v18 = vadd.f32 %v1008_v11, %v896_v6  ;;  %v1205_v6 = vld [vmem:[%s4715_s5 + $0x108] sm:$0xff]  ;;  %2629 = vmatprep.subr.mxu1 %v1221_v0  ;;  %v1188_v8 = vld [vmem:[%s4715_s5 + $0x80] sm:$0xff] }
 0x1e7   : > { %v1204_v11 = vld [vmem:[%s4715_s5 + $0x100] sm:$0xff]  ;;  %2630 = vmatpush3.msra.mxu1 %v1205_v6  ;;  %v1281_v61 = vld [vmem:[%s4715_s5 + $0x368] sm:$0xff]  ;;  %v1247_v6 = vld [vmem:[%s4715_s5 + $0x258] sm:$0xff] }
 0x1e8   : > { %v1037_v24 = vcombine.low %v1031_v15, %v1032_v16  ;;  %v1085_v25 = vcombine.high %v1031_v15, %v1032_v16  ;;  %v1030_v26 = vadd.f32 %v1024_v60, %v1014_v18  ;;  %v1033_v31 = vmax.f32 %v1029_v17, 0.0  ;;  %v1174_v60 = vld [vmem:[%s4715_s5 + $0x10] sm:$0xff]  ;;  %2631 = vmatprep.subr.mxu1 %v1220_v9  ;;  %v1264_v0 = vld [vmem:[%s4715_s5 + $0x2e0] sm:$0xff] }
 0x1e9   : > { %2593 = vmatpush3.msra.mxu0 %v1174_v60  ;;  %2632 = vmatpush3.msra.mxu1 %v1204_v11  ;;  %v1249_v60 = vld [vmem:[%s4715_s5 + $0x268] sm:$0xff]  ;;  %v1294_v9 = vld [vmem:[%s4715_s5 + $0x3d0] sm:$0xff]  ;;  %v1292_v17 = vld [vmem:[%s4715_s5 + $0x3c0] sm:$0xff] }
 0x1ea   : > { %v1034_v32 = vmax.f32 %v1030_v26, 0.0  ;;  %v1092_v33 = vrot.slane %v1085_v25, %v3703_v12  ;;  %v1044_v34 = vrot.slane %v1037_v24, %v3703_v12  ;;  %2594 = vmatprep.subr.mxu0 %v1189_v63  ;;  %2671 = vmatprep.subr.mxu1 %v1299_v14  ;;  %v1278_v11 = vld [vmem:[%s4715_s5 + $0x350] sm:$0xff]  ;;  %v1245_v14 = vld [vmem:[%s4715_s5 + $0x248] sm:$0xff] }
 0x1eb   : > { %2595 = vmatpush3.msra.mxu0 %v1173_v5  ;;  %v1295_v5 = vld [vmem:[%s4715_s5 + $0x3d8] sm:$0xff] }
 0x1ec   : > { %v1128_v40 = vcombine.low %v1033_v31, %v1034_v32  ;;  %v1102_v41 = vcombine.high %v1092_v33, %v1092_v33  ;;  %v1099_v43 = vrot.slane %v1092_v33, %v3703_v12  ;;  %v1058_v45 = vcombine.high %v1044_v34, %v1044_v34  ;;  %2596 = vmatprep.subr.mxu0 %v1188_v8  ;;  %v1262_v8 = vld [vmem:[%s4715_s5 + $0x2d0] sm:$0xff] }
 0x1ed   : > { %v1051_v49 = vrot.slane %v1044_v34, %v3703_v12  ;;  %2597 = vmatpush3.msra.mxu0 %v1172_v10  ;;  %v1478_v34 = vsub.s32 3, %v3677_v44  ;;  %v1246_v10 = vld [vmem:[%s4715_s5 + $0x250] sm:$0xff] }
 0x1ee   : > { %v1135_v53 = vrot.slane %v1128_v40, %v3703_v12  ;;  %v1109_v54 = vrot.slane %v1102_v41, %v3703_v12  ;;  %v1065_v55 = vrot.slane %v1058_v45, %v3703_v12  ;;  %1101 = vst.msk [vmem:[#allocation2 + $0x6] sm:$0x3] %vm3744_vm4, %v1099_v43  ;;  %v1116_v56 = vcombine.high %v1099_v43, %v1099_v43  ;;  %v1251_v45 = vld [vmem:[%s4715_s5 + $0x278] sm:$0xff] }
 0x1ef   : > { %1057 = vst.msk [vmem:[#allocation2] sm:$0x3] %vm3744_vm4, %v1051_v49  ;;  %v1075_v59 = vcombine.high %v1051_v49, %v1051_v49  ;;  %2636 = vmatprep.subr.mxu0 %v1267_v13  ;;  %v1293_v13 = vld [vmem:[%s4715_s5 + $0x3c8] sm:$0xff] }
 0x1f0   : > { %1110 = vrot.lane.b32.xlu1 %v1109_v54, %s3104_s12  ;;  %1066 = vrot.lane.b32.xlu0 %v1065_v55, %s3104_s12  ;;  %v1145_v62 = vcombine.high %v1135_v53, %v1135_v53  ;;  %1118 = vst.msk [vmem:[#allocation2 + $0x9] sm:$0x3] %vm3744_vm4, %v1116_v56  ;;  %v1142_v1 = vrot.slane %v1135_v53, %v3703_v12  ;;  %v1482_v56 = vsub.s32 4, %v3677_v44  ;;  %v1410_v44 = vld [vmem:[%s4715_s5 + $0x770] sm:$0xff] }
 0x1f1   : > { %1077 = vst.msk [vmem:[#allocation2 + $0x3] sm:$0x3] %vm3744_vm4, %v1075_v59  ;;  %v1119_v2 = vcombine.high %v1109_v54, %v1109_v54  ;;  %v1078_v3 = vcombine.high %v1065_v55, %v1065_v55  ;;  %v1250_v54 = vld [vmem:[%s4715_s5 + $0x270] sm:$0xff]  ;;  %v1297_v59 = vld [vmem:[%s4715_s5 + $0x3e8] sm:$0xff] }
 0x1f2   : > { %v1152_v4 = vrot.slane %v1145_v62, %v3703_v12  ;;  %1144 = vst.msk [vmem:[#allocation2 + $0xc] sm:$0x3] %vm3744_vm4, %v1142_v1  ;;  %v1159_v7 = vcombine.high %v1142_v1, %v1142_v1  ;;  %v1282_v55 = vld [vmem:[%s4715_s5 + $0x370] sm:$0xff]  ;;  %v1296_v1 = vld [vmem:[%s4715_s5 + $0x3e0] sm:$0xff] }
 0x1f4   : > { %1120 = vrot.lane.b32.xlu1 %v1119_v2, %s3104_s12  ;;  %1079 = vrot.lane.b32.xlu0 %v1078_v3, %s3104_s12  ;;  %1161 = vst.msk [vmem:[#allocation2 + $0xf] sm:$0x3] %vm3744_vm4, %v1159_v7  ;;  %v1162_v12 = vcombine.high %v1152_v4, %v1152_v4  ;;  %v1248_v2 = vld [vmem:[%s4715_s5 + $0x260] sm:$0xff]  ;;  %v1279_v7 = vld [vmem:[%s4715_s5 + $0x358] sm:$0xff] }
 0x1f5   : > { %v1280_v3 = vld [vmem:[%s4715_s5 + $0x360] sm:$0xff] }
 0x1f8   : > { %1153 = vrot.lane.b32.xlu0 %v1152_v4, %s3104_s12  ;;  %1163 = vrot.lane.b32.xlu1 %v1162_v12, %s3104_s12  ;;  %v1263_v4 = vld [vmem:[%s4715_s5 + $0x2d8] sm:$0xff]  ;;  %v1261_v12 = vld [vmem:[%s4715_s5 + $0x2c8] sm:$0xff]  ;;  %s3108_s12 = smov [#allocation3]  }
 0x1f9   : > { %s3044_s30 = sshll.u32 %s3108_s12, 4  ;;  %s3045_s30 = int_to_ptr.vmem [resolvable:$false] %s3044_s30 }
 0x1fa   : > { %s3046_s21 = scalar_lea.vmem %s3045_s30, 32  ;;  %p3047_p0 = scmp.lt.s32.totalorder %s2385_s19, %s3045_s30 }
 0x1fb   : > { %p3048_p1 = scmp.lt.s32.totalorder %s3046_s21, %s3040_s29 }
 0x1fd   : > { %p3049_p2 = por %p3048_p1, %p3047_p0 }
 0x1ff   : > { %p3050_p3 = pnand %p3049_p2, %p3043_p13 }
 0x262   : > { %v1111_v15 = vpop.permute.xlu1 %1110  ;;  %v1067_v16 = vpop.permute.xlu0 %1066 }
 0x263   : > { %v1112_v18 = vrot.slane %v1111_v15, 7  ;;  %v1068_v19 = vrot.slane %v1067_v16, 7 }
 0x265   : > { %v1113_v20 = vsel %vm409_vm1, %v1112_v18, %v1111_v15  ;;  %v1069_v21 = vsel %vm409_vm1, %v1068_v19, %v1067_v16  ;;  %v1277_v15 = vld [vmem:[%s4715_s5 + $0x348] sm:$0xff]  ;;  %v1260_v16 = vld [vmem:[%s4715_s5 + $0x2c0] sm:$0xff] }
 0x266   : > { %1115 = vst.msk [vmem:[#allocation2 + $0x7] sm:$0x3] %vm3835_vm7, %v1113_v20  ;;  %1074 = vst.msk [vmem:[#allocation2 + $0x1] sm:$0x3] %vm3835_vm7, %v1069_v21  ;;  %v1121_v22 = vpop.permute.xlu1 %1120  ;;  %v1080_v42 = vpop.permute.xlu0 %1079  ;;  %v1244_v18 = vld [vmem:[%s4715_s5 + $0x240] sm:$0xff]  ;;  %v1259_v20 = vld [vmem:[%s4715_s5 + $0x2b8] sm:$0xff] }
 0x267   : > { %v1122_v24 = vrot.slane %v1121_v22, 7  ;;  %v1081_v25 = vrot.slane %v1080_v42, 7  ;;  %v1276_v19 = vld [vmem:[%s4715_s5 + $0x340] sm:$0xff]  ;;  %v1291_v21 = vld [vmem:[%s4715_s5 + $0x3b8] sm:$0xff] }
 0x269   : > { %v1123_v26 = vsel %vm409_vm1, %v1122_v24, %v1121_v22  ;;  %v1082_v27 = vsel %vm409_vm1, %v1081_v25, %v1080_v42  ;;  %v1243_v22 = vld [vmem:[%s4715_s5 + $0x238] sm:$0xff]  ;;  %v1258_v24 = vld [vmem:[%s4715_s5 + $0x2b0] sm:$0xff] }
 0x26a   : > { %1125 = vst.msk [vmem:[#allocation2 + $0xa] sm:$0x3] %vm3835_vm7, %v1123_v26  ;;  %1084 = vst.msk [vmem:[#allocation2 + $0x4] sm:$0x3] %vm3835_vm7, %v1082_v27  ;;  %v1154_v28 = vpop.permute.xlu0 %1153  ;;  %v1164_v29 = vpop.permute.xlu1 %1163  ;;  %v1275_v42 = vld [vmem:[%s4715_s5 + $0x338] sm:$0xff]  ;;  %v1290_v25 = vld [vmem:[%s4715_s5 + $0x3b0] sm:$0xff] }
 0x26b   : > { %v1155_v30 = vrot.slane %v1154_v28, 7  ;;  %v1165_v31 = vrot.slane %v1164_v29, 7  ;;  %v1242_v26 = vld [vmem:[%s4715_s5 + $0x230] sm:$0xff] }
 0x26c   : > { %v1274_v27 = vld [vmem:[%s4715_s5 + $0x330] sm:$0xff] }
 0x26d   : > { %v1156_v32 = vsel %vm409_vm1, %v1155_v30, %v1154_v28  ;;  %v1166_v33 = vsel %vm409_vm1, %v1165_v31, %v1164_v29  ;;  %v1257_v28 = vld [vmem:[%s4715_s5 + $0x2a8] sm:$0xff] }
 0x26e   : > { %1158 = vst.msk [vmem:[#allocation2 + $0xd] sm:$0x3] %vm3835_vm7, %v1156_v32  ;;  %1168 = vst.msk [vmem:[#allocation2 + $0x10] sm:$0x3] %vm3835_vm7, %v1166_v33  ;;  %v1289_v29 = vld [vmem:[%s4715_s5 + $0x3a8] sm:$0xff]  ;;  %v1256_v32 = vld [vmem:[%s4715_s5 + $0x2a0] sm:$0xff] }
 0x26f   : > { %v1241_v30 = vld [vmem:[%s4715_s5 + $0x228] sm:$0xff]  ;;  %v1288_v33 = vld [vmem:[%s4715_s5 + $0x3a0] sm:$0xff] }
 0x270   : > { %v1273_v31 = vld [vmem:[%s4715_s5 + $0x328] sm:$0xff] }
 0x271   : > { %v3859_v36 = vld [vmem:[#allocation2] sm:$0xff] }
 0x272   : > { %v1471_v39 = vrot.slane %v3859_v36, %v3686_v50  ;;  %v1479_v40 = vrot.slane %v3859_v36, %v1478_v34  ;;  %v1467_v41 = vrot.slane %v3859_v36, %v3680_v47  ;;  %v1475_v43 = vrot.slane %v3859_v36, %v1474_v35 }
 0x273   : > { %v1487_v49 = vrot.slane %v3859_v36, %v1486_v37  ;;  %v1495_v53 = vrot.slane %v3859_v36, %v1494_v38 }
 0x274   : > { %1618 = vmatprep.mubr.f32.mxu0 %v1471_v39  ;;  %1688 = vmatprep.mubr.f32.mxu1 %v1479_v40  ;;  %v1240_v39 = vld [vmem:[%s4715_s5 + $0x220] sm:$0xff] }
 0x275   : > { %1619 = vmatmul.mubr.f32.vlgmr.msra.gmra.mxu0 %v1467_v41  ;;  %1689 = vmatmul.mubr.f32.vlgmr.msra.gmra.mxu1 %v1475_v43  ;;  %v3888_v52 = vld [vmem:[#allocation2 + $0x8] sm:$0xff]  ;;  %v1272_v40 = vld [vmem:[%s4715_s5 + $0x320] sm:$0xff]  ;;  %v1255_v41 = vld [vmem:[%s4715_s5 + $0x298] sm:$0xff] }
 0x276   : > { %2637 = vmatpush3.msra.mxu0 %v1251_v45  ;;  %2672 = vmatpush3.msra.mxu1 %v1283_v46  ;;  %v3916_v62 = vrot.slane %v3888_v52, %v1482_v56  ;;  %v3921_v63 = vrot.slane %v3888_v52, %v1490_v57  ;;  %v1287_v43 = vld [vmem:[%s4715_s5 + $0x398] sm:$0xff] }
 0x277   : > { %2638 = vmatprep.subr.mxu0 %v1266_v48  ;;  %1758 = vmatprep.mubr.f32.mxu0 %v1487_v49  ;;  %v1239_v45 = vld [vmem:[%s4715_s5 + $0x218] sm:$0xff]  ;;  %v1254_v48 = vld [vmem:[%s4715_s5 + $0x290] sm:$0xff] }
 0x278   : > { %2673 = vmatprep.subr.mxu1 %v1298_v51  ;;  %1828 = vmatprep.mubr.f32.mxu1 %v1495_v53  ;;  %v1271_v46 = vld [vmem:[%s4715_s5 + $0x318] sm:$0xff]  ;;  %v1286_v49 = vld [vmem:[%s4715_s5 + $0x390] sm:$0xff] }
 0x279   : > { %2639 = vmatpush3.msra.mxu0 %v1250_v54  ;;  %2674 = vmatpush3.msra.mxu1 %v1282_v55  ;;  %v1238_v51 = vld [vmem:[%s4715_s5 + $0x210] sm:$0xff]  ;;  %v1253_v54 = vld [vmem:[%s4715_s5 + $0x288] sm:$0xff] }
 0x27a   : > { %2640 = vmatprep.subr.mxu0 %v1265_v58  ;;  %2675 = vmatprep.subr.mxu1 %v1297_v59  ;;  %v1270_v53 = vld [vmem:[%s4715_s5 + $0x310] sm:$0xff]  ;;  %v1285_v55 = vld [vmem:[%s4715_s5 + $0x388] sm:$0xff] }
 0x27b   : > { %2641 = vmatpush3.msra.mxu0 %v1249_v60  ;;  %2676 = vmatpush3.msra.mxu1 %v1281_v61  ;;  %v1237_v58 = vld [vmem:[%s4715_s5 + $0x208] sm:$0xff]  ;;  %v1252_v60 = vld [vmem:[%s4715_s5 + $0x280] sm:$0xff] }
 0x27c   : > { %2642 = vmatprep.subr.mxu0 %v1264_v0  ;;  %2677 = vmatprep.subr.mxu1 %v1296_v1  ;;  %v1269_v59 = vld [vmem:[%s4715_s5 + $0x308] sm:$0xff]  ;;  %v1284_v61 = vld [vmem:[%s4715_s5 + $0x380] sm:$0xff] }
 0x27d   : > { %2643 = vmatpush3.msra.mxu0 %v1248_v2  ;;  %2678 = vmatpush3.msra.mxu1 %v1280_v3  ;;  %v1236_v0 = vld [vmem:[%s4715_s5 + $0x200] sm:$0xff]  ;;  %v1483_v2 = vrot.slane %v3859_v36, %v1482_v56  ;;  %v1491_v3 = vrot.slane %v3859_v36, %v1490_v57  ;;  %v1503_v56 = vrot.slane %v3888_v52, %v3686_v50  ;;  %v1347_v36 = vld [vmem:[%s4715_s5 + $0x578] sm:$0xff] }
 0x27e   : > { %2644 = vmatprep.subr.mxu0 %v1263_v4  ;;  %2679 = vmatprep.subr.mxu1 %v1295_v5  ;;  %v1268_v1 = vld [vmem:[%s4715_s5 + $0x300] sm:$0xff]  ;;  %v1331_v4 = vld [vmem:[%s4715_s5 + $0x4f8] sm:$0xff]  ;;  %v1511_v57 = vrot.slane %v3888_v52, %v1478_v34  ;;  %v1329_v34 = vld [vmem:[%s4715_s5 + $0x4e8] sm:$0xff] }
 0x27f   : > { %2645 = vmatpush3.msra.mxu0 %v1247_v6  ;;  %2680 = vmatpush3.msra.mxu1 %v1279_v7  ;;  %v1363_v5 = vld [vmem:[%s4715_s5 + $0x5f8] sm:$0xff]  ;;  %v1330_v7 = vld [vmem:[%s4715_s5 + $0x4f0] sm:$0xff] }
 0x280   : > { %2646 = vmatprep.subr.mxu0 %v1262_v8  ;;  %2681 = vmatprep.subr.mxu1 %v1294_v9  ;;  %v1315_v6 = vld [vmem:[%s4715_s5 + $0x478] sm:$0xff]  ;;  %v1362_v8 = vld [vmem:[%s4715_s5 + $0x5f0] sm:$0xff] }
 0x281   : > { %2647 = vmatpush3.msra.mxu0 %v1246_v10  ;;  %2682 = vmatpush3.msra.mxu1 %v1278_v11  ;;  %v1314_v9 = vld [vmem:[%s4715_s5 + $0x470] sm:$0xff]  ;;  %v1361_v11 = vld [vmem:[%s4715_s5 + $0x5e8] sm:$0xff] }
 0x282   : > { %2648 = vmatprep.subr.mxu0 %v1261_v12  ;;  %2683 = vmatprep.subr.mxu1 %v1293_v13  ;;  %v1346_v10 = vld [vmem:[%s4715_s5 + $0x570] sm:$0xff]  ;;  %v1313_v12 = vld [vmem:[%s4715_s5 + $0x468] sm:$0xff] }
 0x283   : > { %2649 = vmatpush3.msra.mxu0 %v1245_v14  ;;  %2684 = vmatpush3.msra.mxu1 %v1277_v15  ;;  %v1345_v13 = vld [vmem:[%s4715_s5 + $0x568] sm:$0xff]  ;;  %v1328_v14 = vld [vmem:[%s4715_s5 + $0x4e0] sm:$0xff] }
 0x284   : > { %2650 = vmatprep.subr.mxu0 %v1260_v16  ;;  %2685 = vmatprep.subr.mxu1 %v1292_v17  ;;  %v1360_v15 = vld [vmem:[%s4715_s5 + $0x5e0] sm:$0xff] }
 0x285   : > { %2651 = vmatpush3.msra.mxu0 %v1244_v18  ;;  %2686 = vmatpush3.msra.mxu1 %v1276_v19  ;;  %v1312_v16 = vld [vmem:[%s4715_s5 + $0x460] sm:$0xff]  ;;  %v1327_v18 = vld [vmem:[%s4715_s5 + $0x4d8] sm:$0xff] }
 0x286   : > { %2652 = vmatprep.subr.mxu0 %v1259_v20  ;;  %2687 = vmatprep.subr.mxu1 %v1291_v21  ;;  %v1344_v17 = vld [vmem:[%s4715_s5 + $0x560] sm:$0xff]  ;;  %v1359_v19 = vld [vmem:[%s4715_s5 + $0x5d8] sm:$0xff] }
 0x287   : > { %2653 = vmatpush3.msra.mxu0 %v1243_v22  ;;  %2688 = vmatpush3.msra.mxu1 %v1275_v42  ;;  %v1311_v20 = vld [vmem:[%s4715_s5 + $0x458] sm:$0xff]  ;;  %v1326_v22 = vld [vmem:[%s4715_s5 + $0x4d0] sm:$0xff] }
 0x288   : > { %2654 = vmatprep.subr.mxu0 %v1258_v24  ;;  %2689 = vmatprep.subr.mxu1 %v1290_v25  ;;  %v1343_v21 = vld [vmem:[%s4715_s5 + $0x558] sm:$0xff]  ;;  %v1358_v42 = vld [vmem:[%s4715_s5 + $0x5d0] sm:$0xff] }
 0x289   : > { %2655 = vmatpush3.msra.mxu0 %v1242_v26  ;;  %2690 = vmatpush3.msra.mxu1 %v1274_v27  ;;  %v1310_v24 = vld [vmem:[%s4715_s5 + $0x450] sm:$0xff]  ;;  %v1325_v26 = vld [vmem:[%s4715_s5 + $0x4c8] sm:$0xff] }
 0x28a   : > { %2656 = vmatprep.subr.mxu0 %v1257_v28  ;;  %2691 = vmatprep.subr.mxu1 %v1289_v29  ;;  %v1342_v25 = vld [vmem:[%s4715_s5 + $0x550] sm:$0xff]  ;;  %v1357_v27 = vld [vmem:[%s4715_s5 + $0x5c8] sm:$0xff] }
 0x28b   : > { %2657 = vmatpush3.msra.mxu0 %v1241_v30  ;;  %2692 = vmatpush3.msra.mxu1 %v1273_v31  ;;  %v1309_v28 = vld [vmem:[%s4715_s5 + $0x448] sm:$0xff]  ;;  %v1324_v30 = vld [vmem:[%s4715_s5 + $0x4c0] sm:$0xff] }
 0x28c   : > { %2658 = vmatprep.subr.mxu0 %v1256_v32  ;;  %2693 = vmatprep.subr.mxu1 %v1288_v33  ;;  %v1341_v29 = vld [vmem:[%s4715_s5 + $0x548] sm:$0xff]  ;;  %v1356_v31 = vld [vmem:[%s4715_s5 + $0x5c0] sm:$0xff] }
 0x28d   : > { %2659 = vmatpush3.msra.mxu0 %v1240_v39  ;;  %2694 = vmatpush3.msra.mxu1 %v1272_v40  ;;  %v1308_v32 = vld [vmem:[%s4715_s5 + $0x440] sm:$0xff]  ;;  %v1323_v39 = vld [vmem:[%s4715_s5 + $0x4b8] sm:$0xff] }
 0x28e   : > { %2660 = vmatprep.subr.mxu0 %v1255_v41  ;;  %2695 = vmatprep.subr.mxu1 %v1287_v43  ;;  %v1340_v33 = vld [vmem:[%s4715_s5 + $0x540] sm:$0xff]  ;;  %v1355_v40 = vld [vmem:[%s4715_s5 + $0x5b8] sm:$0xff] }
 0x28f   : > { %2661 = vmatpush3.msra.mxu0 %v1239_v45  ;;  %2696 = vmatpush3.msra.mxu1 %v1271_v46  ;;  %v1307_v41 = vld [vmem:[%s4715_s5 + $0x438] sm:$0xff]  ;;  %v1322_v45 = vld [vmem:[%s4715_s5 + $0x4b0] sm:$0xff] }
 0x290   : > { %2662 = vmatprep.subr.mxu0 %v1254_v48  ;;  %2697 = vmatprep.subr.mxu1 %v1286_v49  ;;  %v1339_v43 = vld [vmem:[%s4715_s5 + $0x538] sm:$0xff]  ;;  %v1354_v46 = vld [vmem:[%s4715_s5 + $0x5b0] sm:$0xff] }
 0x291   : > { %2663 = vmatpush3.msra.mxu0 %v1238_v51  ;;  %2698 = vmatpush3.msra.mxu1 %v1270_v53  ;;  %v1306_v48 = vld [vmem:[%s4715_s5 + $0x430] sm:$0xff]  ;;  %v1321_v51 = vld [vmem:[%s4715_s5 + $0x4a8] sm:$0xff] }
 0x292   : > { %2664 = vmatprep.subr.mxu0 %v1253_v54  ;;  %2699 = vmatprep.subr.mxu1 %v1285_v55  ;;  %v1338_v49 = vld [vmem:[%s4715_s5 + $0x530] sm:$0xff]  ;;  %v1353_v53 = vld [vmem:[%s4715_s5 + $0x5a8] sm:$0xff] }
 0x293   : > { %2665 = vmatpush3.msra.mxu0 %v1237_v58  ;;  %2700 = vmatpush3.msra.mxu1 %v1269_v59  ;;  %v1305_v54 = vld [vmem:[%s4715_s5 + $0x428] sm:$0xff]  ;;  %v1320_v58 = vld [vmem:[%s4715_s5 + $0x4a0] sm:$0xff] }
 0x294   : > { %2666 = vmatprep.subr.mxu0 %v1252_v60  ;;  %2701 = vmatprep.subr.mxu1 %v1284_v61  ;;  %v1337_v55 = vld [vmem:[%s4715_s5 + $0x528] sm:$0xff]  ;;  %v1352_v59 = vld [vmem:[%s4715_s5 + $0x5a0] sm:$0xff] }
 0x295   : > { %2667 = vmatpush3.msra.mxu0 %v1236_v0  ;;  %2702 = vmatpush3.msra.mxu1 %v1268_v1  ;;  %v1304_v60 = vld [vmem:[%s4715_s5 + $0x420] sm:$0xff]  ;;  %v1319_v0 = vld [vmem:[%s4715_s5 + $0x498] sm:$0xff] }
 0x296   : > { %1759 = vmatmul.mubr.f32.vlgmr.msra.gmra.mxu0 %v1483_v2  ;;  %1829 = vmatmul.mubr.f32.vlgmr.msra.gmra.mxu1 %v1491_v3  ;;  %v1336_v61 = vld [vmem:[%s4715_s5 + $0x520] sm:$0xff]  ;;  %v1351_v1 = vld [vmem:[%s4715_s5 + $0x598] sm:$0xff] }
 0x297   : > { %2706 = vmatprep.subr.mxu0 %v1331_v4  ;;  %2741 = vmatprep.subr.mxu1 %v1363_v5  ;;  %v1303_v2 = vld [vmem:[%s4715_s5 + $0x418] sm:$0xff]  ;;  %v1318_v4 = vld [vmem:[%s4715_s5 + $0x490] sm:$0xff] }
 0x298   : > { %2707 = vmatpush3.msra.mxu0 %v1315_v6  ;;  %1898 = vmatprep.mubr.f32.mxu0 %v1503_v56  ;;  %v1335_v3 = vld [vmem:[%s4715_s5 + $0x518] sm:$0xff]  ;;  %v1350_v5 = vld [vmem:[%s4715_s5 + $0x590] sm:$0xff] }
 0x299   : > { %2742 = vmatpush3.msra.mxu1 %v1347_v36  ;;  %1968 = vmatprep.mubr.f32.mxu1 %v1511_v57  ;;  %v1302_v6 = vld [vmem:[%s4715_s5 + $0x410] sm:$0xff]  ;;  %v1317_v36 = vld [vmem:[%s4715_s5 + $0x488] sm:$0xff] }
 0x29a   : > { %2708 = vmatprep.subr.mxu0 %v1330_v7  ;;  %2743 = vmatprep.subr.mxu1 %v1362_v8  ;;  %v1334_v56 = vld [vmem:[%s4715_s5 + $0x510] sm:$0xff]  ;;  %v1349_v57 = vld [vmem:[%s4715_s5 + $0x588] sm:$0xff] }
 0x29b   : > { %2709 = vmatpush3.msra.mxu0 %v1314_v9  ;;  %2744 = vmatpush3.msra.mxu1 %v1346_v10  ;;  %v1301_v7 = vld [vmem:[%s4715_s5 + $0x408] sm:$0xff]  ;;  %v1316_v9 = vld [vmem:[%s4715_s5 + $0x480] sm:$0xff] }
 0x29c   : > { %2710 = vmatprep.subr.mxu0 %v1329_v34  ;;  %2745 = vmatprep.subr.mxu1 %v1361_v11  ;;  %v1333_v8 = vld [vmem:[%s4715_s5 + $0x508] sm:$0xff]  ;;  %v1348_v10 = vld [vmem:[%s4715_s5 + $0x580] sm:$0xff] }
 0x29d   : > { %2711 = vmatpush3.msra.mxu0 %v1313_v12  ;;  %2746 = vmatpush3.msra.mxu1 %v1345_v13  ;;  %v1300_v34 = vld [vmem:[%s4715_s5 + $0x400] sm:$0xff]  ;;  %v1499_v12 = vrot.slane %v3888_v52, %v3680_v47  ;;  %v1507_v13 = vrot.slane %v3888_v52, %v1474_v35  ;;  %v1519_v35 = vrot.slane %v3888_v52, %v1486_v37  ;;  %v1378_v37 = vld [vmem:[%s4715_s5 + $0x670] sm:$0xff] }
 0x29e   : > { %2712 = vmatprep.subr.mxu0 %v1328_v14  ;;  %2747 = vmatprep.subr.mxu1 %v1360_v15  ;;  %v1332_v11 = vld [vmem:[%s4715_s5 + $0x500] sm:$0xff]  ;;  %v1395_v14 = vld [vmem:[%s4715_s5 + $0x6f8] sm:$0xff] }
 0x29f   : > { %2713 = vmatpush3.msra.mxu0 %v1312_v16  ;;  %2748 = vmatpush3.msra.mxu1 %v1344_v17  ;;  %v1427_v15 = vld [vmem:[%s4715_s5 + $0x7f8] sm:$0xff] }
 0x2a0   : > { %2714 = vmatprep.subr.mxu0 %v1327_v18  ;;  %2749 = vmatprep.subr.mxu1 %v1359_v19  ;;  %v1379_v16 = vld [vmem:[%s4715_s5 + $0x678] sm:$0xff]  ;;  %v1527_v18 = vrot.slane %v3888_v52, %v1494_v38  ;;  %v1394_v19 = vld [vmem:[%s4715_s5 + $0x6f0] sm:$0xff]  ;;  %v1393_v38 = vld [vmem:[%s4715_s5 + $0x6e8] sm:$0xff] }
 0x2a1   : > { %2715 = vmatpush3.msra.mxu0 %v1311_v20  ;;  %2750 = vmatpush3.msra.mxu1 %v1343_v21  ;;  %v1411_v17 = vld [vmem:[%s4715_s5 + $0x778] sm:$0xff]  ;;  %v1426_v20 = vld [vmem:[%s4715_s5 + $0x7f0] sm:$0xff]  ;;  %v1425_v52 = vld [vmem:[%s4715_s5 + $0x7e8] sm:$0xff] }
 0x2a2   : > { %2716 = vmatprep.subr.mxu0 %v1326_v22  ;;  %2751 = vmatprep.subr.mxu1 %v1358_v42  ;;  %v1377_v21 = vld [vmem:[%s4715_s5 + $0x668] sm:$0xff]  ;;  %v1392_v42 = vld [vmem:[%s4715_s5 + $0x6e0] sm:$0xff] }
 0x2a3   : > { %2717 = vmatpush3.msra.mxu0 %v1310_v24  ;;  %2752 = vmatpush3.msra.mxu1 %v1342_v25  ;;  %v1409_v22 = vld [vmem:[%s4715_s5 + $0x768] sm:$0xff]  ;;  %v1424_v24 = vld [vmem:[%s4715_s5 + $0x7e0] sm:$0xff] }
 0x2a4   : > { %2718 = vmatprep.subr.mxu0 %v1325_v26  ;;  %2753 = vmatprep.subr.mxu1 %v1357_v27  ;;  %v1376_v25 = vld [vmem:[%s4715_s5 + $0x660] sm:$0xff]  ;;  %v1391_v27 = vld [vmem:[%s4715_s5 + $0x6d8] sm:$0xff] }
 0x2a5   : > { %2719 = vmatpush3.msra.mxu0 %v1309_v28  ;;  %2754 = vmatpush3.msra.mxu1 %v1341_v29  ;;  %v1408_v26 = vld [vmem:[%s4715_s5 + $0x760] sm:$0xff]  ;;  %v1423_v28 = vld [vmem:[%s4715_s5 + $0x7d8] sm:$0xff] }
 0x2a6   : > { %2720 = vmatprep.subr.mxu0 %v1324_v30  ;;  %2755 = vmatprep.subr.mxu1 %v1356_v31  ;;  %v1375_v29 = vld [vmem:[%s4715_s5 + $0x658] sm:$0xff]  ;;  %v1390_v31 = vld [vmem:[%s4715_s5 + $0x6d0] sm:$0xff] }
 0x2a7   : > { %2721 = vmatpush3.msra.mxu0 %v1308_v32  ;;  %2756 = vmatpush3.msra.mxu1 %v1340_v33  ;;  %v1407_v30 = vld [vmem:[%s4715_s5 + $0x758] sm:$0xff]  ;;  %v1422_v32 = vld [vmem:[%s4715_s5 + $0x7d0] sm:$0xff] }
 0x2a8   : > { %2722 = vmatprep.subr.mxu0 %v1323_v39  ;;  %2757 = vmatprep.subr.mxu1 %v1355_v40  ;;  %v1374_v33 = vld [vmem:[%s4715_s5 + $0x650] sm:$0xff]  ;;  %v1389_v40 = vld [vmem:[%s4715_s5 + $0x6c8] sm:$0xff] }
 0x2a9   : > { %2723 = vmatpush3.msra.mxu0 %v1307_v41  ;;  %2758 = vmatpush3.msra.mxu1 %v1339_v43  ;;  %v1406_v39 = vld [vmem:[%s4715_s5 + $0x750] sm:$0xff]  ;;  %v1421_v41 = vld [vmem:[%s4715_s5 + $0x7c8] sm:$0xff] }
 0x2aa   : > { %2724 = vmatprep.subr.mxu0 %v1322_v45  ;;  %2759 = vmatprep.subr.mxu1 %v1354_v46  ;;  %v1373_v43 = vld [vmem:[%s4715_s5 + $0x648] sm:$0xff]  ;;  %v1388_v46 = vld [vmem:[%s4715_s5 + $0x6c0] sm:$0xff] }
 0x2ab   : > { %2725 = vmatpush3.msra.mxu0 %v1306_v48  ;;  %2760 = vmatpush3.msra.mxu1 %v1338_v49  ;;  %v1405_v45 = vld [vmem:[%s4715_s5 + $0x748] sm:$0xff]  ;;  %v1420_v48 = vld [vmem:[%s4715_s5 + $0x7c0] sm:$0xff] }
 0x2ac   : > { %2726 = vmatprep.subr.mxu0 %v1321_v51  ;;  %2761 = vmatprep.subr.mxu1 %v1353_v53  ;;  %v1372_v49 = vld [vmem:[%s4715_s5 + $0x640] sm:$0xff]  ;;  %v1387_v53 = vld [vmem:[%s4715_s5 + $0x6b8] sm:$0xff] }
 0x2ad   : > { %2727 = vmatpush3.msra.mxu0 %v1305_v54  ;;  %2762 = vmatpush3.msra.mxu1 %v1337_v55  ;;  %v1404_v51 = vld [vmem:[%s4715_s5 + $0x740] sm:$0xff]  ;;  %v1419_v54 = vld [vmem:[%s4715_s5 + $0x7b8] sm:$0xff] }
 0x2ae   : > { %2728 = vmatprep.subr.mxu0 %v1320_v58  ;;  %2763 = vmatprep.subr.mxu1 %v1352_v59  ;;  %v1371_v55 = vld [vmem:[%s4715_s5 + $0x638] sm:$0xff]  ;;  %v1386_v59 = vld [vmem:[%s4715_s5 + $0x6b0] sm:$0xff] }
 0x2af   : > { %2729 = vmatpush3.msra.mxu0 %v1304_v60  ;;  %2764 = vmatpush3.msra.mxu1 %v1336_v61  ;;  %v1403_v58 = vld [vmem:[%s4715_s5 + $0x738] sm:$0xff]  ;;  %v1418_v60 = vld [vmem:[%s4715_s5 + $0x7b0] sm:$0xff] }
 0x2b0   : > { %2730 = vmatprep.subr.mxu0 %v1319_v0  ;;  %2765 = vmatprep.subr.mxu1 %v1351_v1  ;;  %v1370_v61 = vld [vmem:[%s4715_s5 + $0x630] sm:$0xff]  ;;  %v1385_v1 = vld [vmem:[%s4715_s5 + $0x6a8] sm:$0xff] }
 0x2b1   : > { %2731 = vmatpush3.msra.mxu0 %v1303_v2  ;;  %2766 = vmatpush3.msra.mxu1 %v1335_v3  ;;  %v1402_v0 = vld [vmem:[%s4715_s5 + $0x730] sm:$0xff]  ;;  %v1417_v2 = vld [vmem:[%s4715_s5 + $0x7a8] sm:$0xff] }
 0x2b2   : > { %2732 = vmatprep.subr.mxu0 %v1318_v4  ;;  %2767 = vmatprep.subr.mxu1 %v1350_v5  ;;  %v1369_v3 = vld [vmem:[%s4715_s5 + $0x628] sm:$0xff]  ;;  %v1384_v5 = vld [vmem:[%s4715_s5 + $0x6a0] sm:$0xff] }
 0x2b3   : > { %2733 = vmatpush3.msra.mxu0 %v1302_v6  ;;  %2768 = vmatpush3.msra.mxu1 %v1334_v56  ;;  %v1401_v4 = vld [vmem:[%s4715_s5 + $0x728] sm:$0xff]  ;;  %v1416_v6 = vld [vmem:[%s4715_s5 + $0x7a0] sm:$0xff] }
 0x2b4   : > { %2734 = vmatprep.subr.mxu0 %v1317_v36  ;;  %2769 = vmatprep.subr.mxu1 %v1349_v57  ;;  %v1368_v56 = vld [vmem:[%s4715_s5 + $0x620] sm:$0xff]  ;;  %v1383_v57 = vld [vmem:[%s4715_s5 + $0x698] sm:$0xff] }
 0x2b5   : > { %2735 = vmatpush3.msra.mxu0 %v1301_v7  ;;  %2770 = vmatpush3.msra.mxu1 %v1333_v8  ;;  %v1400_v36 = vld [vmem:[%s4715_s5 + $0x720] sm:$0xff]  ;;  %v1415_v7 = vld [vmem:[%s4715_s5 + $0x798] sm:$0xff] }
 0x2b6   : > { %2736 = vmatprep.subr.mxu0 %v1316_v9  ;;  %2771 = vmatprep.subr.mxu1 %v1348_v10  ;;  %v1367_v8 = vld [vmem:[%s4715_s5 + $0x618] sm:$0xff]  ;;  %v1382_v10 = vld [vmem:[%s4715_s5 + $0x690] sm:$0xff] }
 0x2b7   : > { %2737 = vmatpush3.msra.mxu0 %v1300_v34  ;;  %2772 = vmatpush3.msra.mxu1 %v1332_v11  ;;  %v1399_v9 = vld [vmem:[%s4715_s5 + $0x718] sm:$0xff]  ;;  %v1414_v34 = vld [vmem:[%s4715_s5 + $0x790] sm:$0xff] }
 0x2b8   : > { %1899 = vmatmul.mubr.f32.vlgmr.msra.gmra.mxu0 %v1499_v12  ;;  %1969 = vmatmul.mubr.f32.vlgmr.msra.gmra.mxu1 %v1507_v13  ;;  %v1366_v11 = vld [vmem:[%s4715_s5 + $0x610] sm:$0xff]  ;;  %v1381_v13 = vld [vmem:[%s4715_s5 + $0x688] sm:$0xff] }
 0x2b9   : > { %2776 = vmatprep.subr.mxu0 %v1395_v14  ;;  %2811 = vmatprep.subr.mxu1 %v1427_v15  ;;  %v1398_v12 = vld [vmem:[%s4715_s5 + $0x710] sm:$0xff]  ;;  %v1413_v14 = vld [vmem:[%s4715_s5 + $0x788] sm:$0xff] }
 0x2ba   : > { %2777 = vmatpush3.msra.mxu0 %v1379_v16  ;;  %2038 = vmatprep.mubr.f32.mxu0 %v1519_v35  ;;  %v1365_v15 = vld [vmem:[%s4715_s5 + $0x608] sm:$0xff]  ;;  %v1380_v35 = vld [vmem:[%s4715_s5 + $0x680] sm:$0xff] }
 0x2bb   : > { %2812 = vmatpush3.msra.mxu1 %v1411_v17  ;;  %2108 = vmatprep.mubr.f32.mxu1 %v1527_v18  ;;  %v1397_v16 = vld [vmem:[%s4715_s5 + $0x708] sm:$0xff]  ;;  %v1412_v17 = vld [vmem:[%s4715_s5 + $0x780] sm:$0xff] }
 0x2bc   : > { %2778 = vmatprep.subr.mxu0 %v1394_v19  ;;  %2813 = vmatprep.subr.mxu1 %v1426_v20  ;;  %v1364_v18 = vld [vmem:[%s4715_s5 + $0x600] sm:$0xff]  ;;  %v4485_v20 = vld [vmem:[#allocation2 + $0x10] sm:$0x3] }
 0x2bd   : > { %2779 = vmatpush3.msra.mxu0 %v1378_v37  ;;  %2814 = vmatpush3.msra.mxu1 %v1410_v44  ;;  %v1396_v19 = vld [vmem:[%s4715_s5 + $0x700] sm:$0xff]  ;;  %v1459_v37 = vld [vmem:[%s4715_s5 + $0x8f8] sm:$0xff] }
 0x2be   : > { %2780 = vmatprep.subr.mxu0 %v1393_v38  ;;  %2815 = vmatprep.subr.mxu1 %v1425_v52  ;;  %v1443_v44 = vld [vmem:[%s4715_s5 + $0x878] sm:$0xff]  ;;  %v1535_v38 = vrot.slane %v4485_v20, %v3686_v50  ;;  %v1458_v52 = vld [vmem:[%s4715_s5 + $0x8f0] sm:$0xff]  ;;  %v1441_v50 = vld [vmem:[%s4715_s5 + $0x868] sm:$0xff] }
 0x2bf   : > { %2781 = vmatpush3.msra.mxu0 %v1377_v21  ;;  %2816 = vmatpush3.msra.mxu1 %v1409_v22  ;;  %v1442_v21 = vld [vmem:[%s4715_s5 + $0x870] sm:$0xff]  ;;  %v1457_v22 = vld [vmem:[%s4715_s5 + $0x8e8] sm:$0xff] }
 0x2c0   : > { %2782 = vmatprep.subr.mxu0 %v1392_v42  ;;  %2817 = vmatprep.subr.mxu1 %v1424_v24  ;;  %v1455_v42 = vld [vmem:[%s4715_s5 + $0x8d8] sm:$0xff] }
 0x2c1   : > { %2783 = vmatpush3.msra.mxu0 %v1376_v25  ;;  %2818 = vmatpush3.msra.mxu1 %v1408_v26  ;;  %v1439_v24 = vld [vmem:[%s4715_s5 + $0x858] sm:$0xff]  ;;  %v1454_v25 = vld [vmem:[%s4715_s5 + $0x8d0] sm:$0xff] }
 0x2c2   : > { %2784 = vmatprep.subr.mxu0 %v1391_v27  ;;  %2819 = vmatprep.subr.mxu1 %v1423_v28  ;;  %v1438_v26 = vld [vmem:[%s4715_s5 + $0x850] sm:$0xff]  ;;  %v1453_v27 = vld [vmem:[%s4715_s5 + $0x8c8] sm:$0xff] }
 0x2c3   : > { %2785 = vmatpush3.msra.mxu0 %v1375_v29  ;;  %2820 = vmatpush3.msra.mxu1 %v1407_v30  ;;  %v1437_v28 = vld [vmem:[%s4715_s5 + $0x848] sm:$0xff]  ;;  %v1452_v29 = vld [vmem:[%s4715_s5 + $0x8c0] sm:$0xff] }
 0x2c4   : > { %2786 = vmatprep.subr.mxu0 %v1390_v31  ;;  %2821 = vmatprep.subr.mxu1 %v1422_v32  ;;  %v1436_v30 = vld [vmem:[%s4715_s5 + $0x840] sm:$0xff]  ;;  %v1451_v31 = vld [vmem:[%s4715_s5 + $0x8b8] sm:$0xff] }
 0x2c5   : > { %2787 = vmatpush3.msra.mxu0 %v1374_v33  ;;  %2822 = vmatpush3.msra.mxu1 %v1406_v39  ;;  %v1435_v32 = vld [vmem:[%s4715_s5 + $0x838] sm:$0xff]  ;;  %v1450_v33 = vld [vmem:[%s4715_s5 + $0x8b0] sm:$0xff] }
 0x2c6   : > { %2788 = vmatprep.subr.mxu0 %v1389_v40  ;;  %2823 = vmatprep.subr.mxu1 %v1421_v41  ;;  %v1434_v39 = vld [vmem:[%s4715_s5 + $0x830] sm:$0xff]  ;;  %v1449_v40 = vld [vmem:[%s4715_s5 + $0x8a8] sm:$0xff] }
 0x2c7   : > { %2789 = vmatpush3.msra.mxu0 %v1373_v43  ;;  %2824 = vmatpush3.msra.mxu1 %v1405_v45  ;;  %v1433_v41 = vld [vmem:[%s4715_s5 + $0x828] sm:$0xff]  ;;  %v1448_v43 = vld [vmem:[%s4715_s5 + $0x8a0] sm:$0xff] }
 0x2c8   : > { %2790 = vmatprep.subr.mxu0 %v1388_v46  ;;  %2825 = vmatprep.subr.mxu1 %v1420_v48  ;;  %v1432_v45 = vld [vmem:[%s4715_s5 + $0x820] sm:$0xff]  ;;  %v1447_v46 = vld [vmem:[%s4715_s5 + $0x898] sm:$0xff] }
 0x2c9   : > { %2791 = vmatpush3.msra.mxu0 %v1372_v49  ;;  %2826 = vmatpush3.msra.mxu1 %v1404_v51  ;;  %v1431_v48 = vld [vmem:[%s4715_s5 + $0x818] sm:$0xff]  ;;  %v1446_v49 = vld [vmem:[%s4715_s5 + $0x890] sm:$0xff] }
 0x2ca   : > { %2792 = vmatprep.subr.mxu0 %v1387_v53  ;;  %2827 = vmatprep.subr.mxu1 %v1419_v54  ;;  %v1430_v51 = vld [vmem:[%s4715_s5 + $0x810] sm:$0xff]  ;;  %v1445_v53 = vld [vmem:[%s4715_s5 + $0x888] sm:$0xff] }
 0x2cb   : > { %2793 = vmatpush3.msra.mxu0 %v1371_v55  ;;  %2828 = vmatpush3.msra.mxu1 %v1403_v58  ;;  %v1429_v54 = vld [vmem:[%s4715_s5 + $0x808] sm:$0xff]  ;;  %v1444_v55 = vld [vmem:[%s4715_s5 + $0x880] sm:$0xff] }
 0x2cc   : > { %2794 = vmatprep.subr.mxu0 %v1386_v59  ;;  %2829 = vmatprep.subr.mxu1 %v1418_v60  ;;  %v1428_v58 = vld [vmem:[%s4715_s5 + $0x800] sm:$0xff]  ;;  %v1531_v59 = vrot.slane %v4485_v20, %v3680_v47  ;;  %v2192_v60 = vld [vmem:[%s4717_s7 + $0x38] sm:$0xff] }
 0x2cd   : > { %2795 = vmatpush3.msra.mxu0 %v1370_v61  ;;  %2830 = vmatpush3.msra.mxu1 %v1402_v0  ;;  %v2191_v61 = vld [vmem:[%s4717_s7 + $0x30] sm:$0xff]  ;;  %v2190_v0 = vld [vmem:[%s4717_s7 + $0x28] sm:$0xff]  ;;  %v2189_v47 = vld [vmem:[%s4717_s7 + $0x20] sm:$0xff] }
 0x2ce   : > { %2796 = vmatprep.subr.mxu0 %v1385_v1  ;;  %2831 = vmatprep.subr.mxu1 %v1417_v2  ;;  %v2188_v1 = vld [vmem:[%s4717_s7 + $0x18] sm:$0xff]  ;;  %v2187_v2 = vld [vmem:[%s4717_s7 + $0x10] sm:$0xff] }
 0x2cf   : > { %2797 = vmatpush3.msra.mxu0 %v1369_v3  ;;  %2832 = vmatpush3.msra.mxu1 %v1401_v4  ;;  %v2186_v3 = vld [vmem:[%s4717_s7 + $0x8] sm:$0xff]  ;;  %v2185_v4 = vld [vmem:[%s4717_s7] sm:$0xff] }
 0x2d0   : > { %2798 = vmatprep.subr.mxu0 %v1384_v5  ;;  %2833 = vmatprep.subr.mxu1 %v1416_v6 }
 0x2d1   : > { %2799 = vmatpush3.msra.mxu0 %v1368_v56  ;;  %2834 = vmatpush3.msra.mxu1 %v1400_v36 }
 0x2d2   : > { %2800 = vmatprep.subr.mxu0 %v1383_v57  ;;  %2835 = vmatprep.subr.mxu1 %v1415_v7  ;;  %v1460_v7 = vld [vmem:[%s4716_s6] sm:$0x1] }
 0x2d3   : > { %2801 = vmatpush3.msra.mxu0 %v1367_v8  ;;  %2836 = vmatpush3.msra.mxu1 %v1399_v9 }
 0x2d4   : > { %2802 = vmatprep.subr.mxu0 %v1382_v10  ;;  %2837 = vmatprep.subr.mxu1 %v1414_v34 }
 0x2d5   : > { %2803 = vmatpush3.msra.mxu0 %v1366_v11  ;;  %2838 = vmatpush3.msra.mxu1 %v1398_v12 }
 0x2d6   : > { %2804 = vmatprep.subr.mxu0 %v1381_v13  ;;  %2839 = vmatprep.subr.mxu1 %v1413_v14 }
 0x2d7   : > { %2805 = vmatpush3.msra.mxu0 %v1365_v15  ;;  %2840 = vmatpush3.msra.mxu1 %v1397_v16 }
 0x2d8   : > { %2806 = vmatprep.subr.mxu0 %v1380_v35  ;;  %2841 = vmatprep.subr.mxu1 %v1412_v17 }
 0x2d9   : > { %2807 = vmatpush3.msra.mxu0 %v1364_v18  ;;  %2842 = vmatpush3.msra.mxu1 %v1396_v19 }
 0x2da   : > { %2039 = vmatmul.mubr.f32.vlgmr.msra.gmra.mxu0 %v3916_v62  ;;  %2109 = vmatmul.mubr.f32.vlgmr.msra.gmra.mxu1 %v3921_v63  ;;  %v1456_v62 = vld [vmem:[%s4715_s5 + $0x8e0] sm:$0xff] }
 0x2db   : > { %2846 = vmatprep.subr.mxu0 %v1459_v37  ;;  %2178 = vmatprep.mubr.f32.mxu0 %v1535_v38  ;;  %v1440_v63 = vld [vmem:[%s4715_s5 + $0x860] sm:$0xff] }
 0x2dc   : > { %2847 = vmatpush3.msra.mxu0 %v1443_v44  ;;  %2956 = vmatprep.subr.mxu1 %v3102_v23 }
 0x2dd   : > { %2848 = vmatprep.subr.mxu0 %v1458_v52  ;;  %2957 = vmatpush3.msra.mxu1 %v2192_v60 }
 0x2de   : > { %2849 = vmatpush3.msra.mxu0 %v1442_v21  ;;  %2958 = vmatprep.subr.mxu1 %v3102_v23 }
 0x2df   : > { %2850 = vmatprep.subr.mxu0 %v1457_v22  ;;  %2959 = vmatpush3.msra.mxu1 %v2191_v61 }
 0x2e0   : > { %2851 = vmatpush3.msra.mxu0 %v1441_v50  ;;  %2960 = vmatprep.subr.mxu1 %v3102_v23 }
 0x2e1   : > { %2852 = vmatprep.subr.mxu0 %v1456_v62  ;;  %2961 = vmatpush3.msra.mxu1 %v2190_v0 }
 0x2e2   : > { %2853 = vmatpush3.msra.mxu0 %v1440_v63  ;;  %2962 = vmatprep.subr.mxu1 %v3102_v23 }
 0x2e3   : > { %2854 = vmatprep.subr.mxu0 %v1455_v42  ;;  %2963 = vmatpush3.msra.mxu1 %v2189_v47 }
 0x2e4   : > { %2855 = vmatpush3.msra.mxu0 %v1439_v24  ;;  %2964 = vmatprep.subr.mxu1 %v3102_v23 }
 0x2e5   : > { %2856 = vmatprep.subr.mxu0 %v1454_v25  ;;  %2965 = vmatpush3.msra.mxu1 %v2188_v1 }
 0x2e6   : > { %2857 = vmatpush3.msra.mxu0 %v1438_v26  ;;  %2966 = vmatprep.subr.mxu1 %v3102_v23 }
 0x2e7   : > { %2858 = vmatprep.subr.mxu0 %v1453_v27  ;;  %2967 = vmatpush3.msra.mxu1 %v2187_v2 }
 0x2e8   : > { %2859 = vmatpush3.msra.mxu0 %v1437_v28  ;;  %2968 = vmatprep.subr.mxu1 %v3102_v23 }
 0x2e9   : > { %2860 = vmatprep.subr.mxu0 %v1452_v29  ;;  %2969 = vmatpush3.msra.mxu1 %v2186_v3 }
 0x2ea   : > { %2861 = vmatpush3.msra.mxu0 %v1436_v30  ;;  %2970 = vmatprep.subr.mxu1 %v3102_v23 }
 0x2eb   : > { %2862 = vmatprep.subr.mxu0 %v1451_v31  ;;  %2971 = vmatpush3.msra.mxu1 %v2185_v4  ;;  %v2275_v31 = vld [vmem:[%s4719_s9 + $0x38] sm:$0xff] }
 0x2ec   : > { %2863 = vmatpush3.msra.mxu0 %v1435_v32  ;;  %2972 = vmatprep.mubr.msk.f32.mxu1 %vm3105_vm8, %v3102_v23  ;;  %v2274_v32 = vld [vmem:[%s4719_s9 + $0x30] sm:$0xff] }
 0x2ed   : > { %2864 = vmatprep.subr.mxu0 %v1450_v33  ;;  %2975 = vmatprep.subr.mxu1 %v3102_v23  ;;  %v2273_v33 = vld [vmem:[%s4719_s9 + $0x28] sm:$0xff] }
 0x2ee   : > { %2865 = vmatpush3.msra.mxu0 %v1434_v39  ;;  %v2272_v39 = vld [vmem:[%s4719_s9 + $0x20] sm:$0xff] }
 0x2ef   : > { %2866 = vmatprep.subr.mxu0 %v1449_v40  ;;  %v2271_v40 = vld [vmem:[%s4719_s9 + $0x18] sm:$0xff] }
 0x2f0   : > { %2867 = vmatpush3.msra.mxu0 %v1433_v41  ;;  %v2270_v41 = vld [vmem:[%s4719_s9 + $0x10] sm:$0xff] }
 0x2f1   : > { %2868 = vmatprep.subr.mxu0 %v1448_v43  ;;  %v2269_v43 = vld [vmem:[%s4719_s9 + $0x8] sm:$0xff] }
 0x2f2   : > { %2869 = vmatpush3.msra.mxu0 %v1432_v45  ;;  %v2268_v45 = vld [vmem:[%s4719_s9] sm:$0xff] }
 0x2f3   : > { %2870 = vmatprep.subr.mxu0 %v1447_v46  ;;  %v2193_v46 = vld [vmem:[%s4718_s8] sm:$0x1] }
 0x2f4   : > { %2871 = vmatpush3.msra.mxu0 %v1431_v48 }
 0x2f5   : > { %2872 = vmatprep.subr.mxu0 %v1446_v49 }
 0x2f6   : > { %2873 = vmatpush3.msra.mxu0 %v1430_v51 }
 0x2f7   : > { %2874 = vmatprep.subr.mxu0 %v1445_v53 }
 0x2f8   : > { %2875 = vmatpush3.msra.mxu0 %v1429_v54  ;;  %v3106_v54 = vmov 0  }
 0x2f9   : > { %2876 = vmatprep.subr.mxu0 %v1444_v55  ;;  %3039 = vset.pattern.permute.xlu0 %v3106_v54 }
 0x2fa   : > { %2877 = vmatpush3.msra.mxu0 %v1428_v58 }
 0x2fb   : > { %2179 = vmatmul.mubr.f32.vlgmr.msra.gmra.mxu0 %v1531_v59 }
 0x335   : > { %v2598_v5 = vpop.f32.mrf.mxu0  ;;  %v2633_v56 = vpop.f32.mrf.mxu1 }
 0x337   : > { %v2599_v6 = vpop.f32.mrf.mxu0  ;;  %v2634_v8 = vpop.f32.mrf.mxu1 }
 0x338   : > { %v2600_v57 = vadd.f32 %v2599_v6, %v2598_v5  ;;  %v2635_v12 = vadd.f32 %v2634_v8, %v2633_v56 }
 0x33a   : > { %v1621_v10 = vadd.f32 %v2600_v57, %v1460_v7 }
 0x33c   : > { %v1691_v14 = vadd.f32 %v2635_v12, %v1621_v10 }
 0x356   : > { %v2668_v36 = vpop.f32.mrf.mxu0  ;;  %v2703_v34 = vpop.f32.mrf.mxu1 }
 0x358   : > { %v2669_v9 = vpop.f32.mrf.mxu0  ;;  %v2704_v15 = vpop.f32.mrf.mxu1 }
 0x359   : > { %v2670_v13 = vadd.f32 %v2669_v9, %v2668_v36  ;;  %v2705_v19 = vadd.f32 %v2704_v15, %v2703_v34 }
 0x35b   : > { %v1761_v35 = vadd.f32 %v2670_v13, %v1691_v14 }
 0x35d   : > { %v1831_v37 = vadd.f32 %v2705_v19, %v1761_v35 }
 0x378   : > { %v2738_v11 = vpop.f32.mrf.mxu0  ;;  %v2773_v17 = vpop.f32.mrf.mxu1 }
 0x37a   : > { %v2739_v16 = vpop.f32.mrf.mxu0  ;;  %v2774_v44 = vpop.f32.mrf.mxu1 }
 0x37b   : > { %v2740_v20 = vadd.f32 %v2739_v16, %v2738_v11  ;;  %v2775_v22 = vadd.f32 %v2774_v44, %v2773_v17 }
 0x37d   : > { %v1901_v52 = vadd.f32 %v2740_v20, %v1831_v37 }
 0x37f   : > { %v1971_v62 = vadd.f32 %v2775_v22, %v1901_v52 }
 0x39a   : > { %v2808_v18 = vpop.f32.mrf.mxu0  ;;  %v2843_v21 = vpop.f32.mrf.mxu1 }
 0x39c   : > { %v2809_v38 = vpop.f32.mrf.mxu0  ;;  %v2844_v63 = vpop.f32.mrf.mxu1 }
 0x39d   : > { %v2810_v50 = vadd.f32 %v2809_v38, %v2808_v18  ;;  %v2845_v25 = vadd.f32 %v2844_v63, %v2843_v21 }
 0x39f   : > { %v2041_v42 = vadd.f32 %v2810_v50, %v1971_v62 }
 0x3a1   : > { %v2111_v27 = vadd.f32 %v2845_v25, %v2041_v42 }
 0x3bb   : > { %v2878_v24 = vpop.f32.mrf.mxu0 }
 0x3bd   : > { %v2879_v26 = vpop.f32.mrf.mxu0 }
 0x3be   : > { %v2880_v28 = vadd.f32 %v2879_v26, %v2878_v24 }
 0x3c0   : > { %v2181_v29 = vadd.f32 %v2880_v28, %v2111_v27 }
 0x3c2   : > { %v2184_v30 = vmax.f32 %v2181_v29, 0.0 }
 0x3c4   : > { %2973 = vmatmul.mubr.msk.f32.vlgmr.msra.gmra.mxu1 %vm409_vm1, %v2184_v30 }
 0x3c5   : > { %2976 = vmatpush3.msra.mxu1 %v2275_v31  ;;  %2991 = vmatprep.mubr.msk.f32.mxu1 %vm3105_vm8, %v3102_v23 }
 0x3c6   : > { %2977 = vmatprep.subr.mxu1 %v3102_v23 }
 0x3c7   : > { %2978 = vmatpush3.msra.mxu1 %v2274_v32 }
 0x3c8   : > { %2979 = vmatprep.subr.mxu1 %v3102_v23 }
 0x3c9   : > { %2980 = vmatpush3.msra.mxu1 %v2273_v33 }
 0x3ca   : > { %2981 = vmatprep.subr.mxu1 %v3102_v23 }
 0x3cb   : > { %2982 = vmatpush3.msra.mxu1 %v2272_v39 }
 0x3cc   : > { %2983 = vmatprep.subr.mxu1 %v3102_v23 }
 0x3cd   : > { %2984 = vmatpush3.msra.mxu1 %v2271_v40 }
 0x3ce   : > { %2985 = vmatprep.subr.mxu1 %v3102_v23 }
 0x3cf   : > { %2986 = vmatpush3.msra.mxu1 %v2270_v41 }
 0x3d0   : > { %2987 = vmatprep.subr.mxu1 %v3102_v23 }
 0x3d1   : > { %2988 = vmatpush3.msra.mxu1 %v2269_v43 }
 0x3d2   : > { %2989 = vmatprep.subr.mxu1 %v3102_v23  ;;  %v2276_v23 = vld [vmem:[%s4720_s10] sm:$0x1] }
 0x3d3   : > { %2990 = vmatpush3.msra.mxu1 %v2268_v45 }
 0x484   : > { %v2263_v48 = vpop.f32.mrf.mxu1 }
 0x485   : > { %v2264_v49 = vadd.f32 %v2263_v48, %v2193_v46 }
 0x486   : > { %v2974_v51 = vpop.f32.mrf.mxu1 }
 0x487   : > { %v2267_v53 = vmax.f32 %v2264_v49, 0.0 }
 0x489   : > { %2992 = vmatmul.mubr.msk.f32.vlgmr.msra.gmra.mxu1 %vm409_vm1, %v2267_v53 }
 0x549   : > { %v2346_v55 = vpop.f32.mrf.mxu1 }
 0x54a   : > { %v2347_v58 = vadd.f32 %v2346_v55, %v2276_v23 }
 0x54b   : > { %v2993_v59 = vpop.f32.mrf.mxu1 }
 0x54c   : > { %2356 = vrot.lane.b32.xlu0 %v2347_v58, %s3107_s13 }
 0x550   : > { %2352 = vperm.xlu0 %3039, %v2347_v58  }
 0x5be   : > { %v2357_v60 = vpop.permute.xlu0 %2356 }
 0x5bf   : > { %v2360_v61 = vsel %vm2359_vm9, %v2357_v60, 0.0 }
 0x5c0   : > { %2361 = vadd.xlane.f32.xlu1 %v2360_v61 }
 0x5cb   : > { %v2353_v0 = vpop.permute.xlu0 %2352 }
 0x5cc   : > { %v2355_v1 = vadd.f32 %v2353_v0, %v2347_v58 }
 0x649   : > { %v2362_v47 = vpop.xlane.xlu1 %2361 }
 0x64a   : > { %v2364_v2 = vmul.f32 0.2, %v2362_v47 }
 0x64c   : > { %v2365_v3 = vsub.f32 %v2355_v1, %v2364_v2 }
 0x64e   : > { %2367 = vrot.lane.b32.xlu0 %v2365_v3, %s3107_s13 }
 0x6c0   : > { %v2368_v4 = vpop.permute.xlu0 %2367 }
 0x6c1   : > { %2370 = vst.msk [vmem:[%s378_s16] sm:$0x1] %vm2359_vm9, %v2368_v4 }
 0x6c2   : > { %3053 = shalt.err (!%p3050_p3)
}
 0x6c3   : > { %s3054_s13 = scalar_lea.hbm %s4674_s24, 16  ;;  %s3058_s16 = scalar_lea.hbm %s4721_s11, 32 }
 0x6c4   : > { %p3055_p4 = scmp.ne.s32.totalorder %s4674_s24, %s3054_s13  ;;  %p3059_p9 = scmp.lt.s32.totalorder %s4674_s24, %s4721_s11 }
 0x6c5   : > { %p3060_p10 = scmp.lt.s32.totalorder %s3058_s16, %s3054_s13 }
 0x6c6   : > { %p3056_p7 = pnand %p3055_p4, %p3207_p5 }
 0x6c7   : > { %p3061_p11 = por %p3060_p10, %p3059_p9 }
 0x6c8   : > { %p3057_p8 = pneg %p3056_p7 }
 0x6ca   : > { %p3062_p12 = pnand %p3061_p11, %p3057_p8 }
 0x6cc   : > { %3065 = shalt.err (!%p3062_p12)
}
 0x6cd   : > { %2994 = dma.vmem_to_hbm [thread:$0]  (%p3207_p5), %s2385_s19, 16, %s4674_s24, %s2372_s25  }
 0x6ce PF: > { %p3000_p13 = scmp.ge.s32.totalorder %s3100_s20, 2  ;;  %s2396_s29 = sand.u32 1, %s3088_s17  }
 0x6cf   : > { %s2397_s12 = scalar_lea.sflag [#allocation4], %s2396_s29 }
 0x6d0   : > { %p2997_p0 = pnand %p3000_p13, %p3211_p6 }
 0x6d2   : > { %p2998_p1 = pneg %p2997_p0 }
 0x6d4   : > { %3083 = dma.done.wait (%p2998_p1), %s2397_s12, 16  }
 0x6d5   : > { %3085 = vsyncadd (%p2998_p1), %s2397_s12, 4294967280  ;;  %s4731_s30 = sld [smem:[#allocation6_spill]]  ;;  %p21_p2 = scmp.ge.s32.totalorder %s3194_s23, 4  }
 0x6d6   : > { %s4732_s19 = sld [smem:[#allocation7_spill]]  ;;  %s4733_s17 = smov %s3092_s18 }
 0x6d7   : > { %s4735_s20 = smov %s3194_s23  ;;  %23 = sbr.rel (!%p21_p2) target bundleno = 3 (0x3), region = 103 }
 0x6db   : > { %s4734_s18 = smov %s4731_s30 }
 0x6dc   :  { %2401 = vsyncpa [#allocation4], 1 }
 0x6dd   :  { %2403 = vsyncpa [#allocation4 + $0x1], 1 }

</bundles_post_ra>
